<compile_context>
chip_gen: v7x
topology: tpu7x:2x2x1
jax: 0.10.0
libtpu: 0.0.40
codegen_flags: <defaults>
</compile_context>

<pallas_src>
import jax
import jax.numpy as jnp
from jax import lax
from jax.experimental import pallas as pl
from jax.experimental.pallas import tpu as pltpu

_EPS = 1e-12


def _round_up(x, m):
    return (x + m - 1) // m * m


# ---------------------------------------------------------------------------
# Generation-aware defaults (all guarded — fall back to safe values).
# ---------------------------------------------------------------------------
def _device_kind():
    try:
        return jax.devices()[0].device_kind.lower()
    except Exception:
        return ""


_KIND = _device_kind()
_IS_V5 = "v5" in _KIND
_IS_V7 = ("v7" in _KIND) or ("tpu7" in _KIND)
# bf16 EUP/VPU only helps on v6e/v7x; on v5e it would just add conversions.
_BF16_GATES_DEFAULT = not _IS_V5


def _vmem_limit_bytes():
    try:
        cap = int(pltpu.get_tpu_info().vmem_capacity_bytes)
    except Exception:
        cap = 128 * 1024 * 1024
    return min(48 * 1024 * 1024, int(0.75 * cap))


def _default_batch_tile(B):
    Bp8 = _round_up(max(int(B), 1), 8)
    if _IS_V7 and Bp8 >= 16:
        # v7x has 2 TensorCores sharded over "parallel" axes: keep >=2 tiles.
        return min(128, _round_up((Bp8 + 1) // 2, 8))
    return min(128, Bp8)


def _const_block_spec(shape, index_map):
    """BlockSpec for operands whose block index never changes across the grid:
    request a single VMEM buffer (no pointless double-buffering of weights)."""
    try:
        return pl.BlockSpec(shape, index_map, pipeline_mode=pl.Buffered(1))
    except Exception:   # older jax without pipeline_mode support
        return pl.BlockSpec(shape, index_map)


# ---------------------------------------------------------------------------
# Image encoder kernel:  l2norm -> fc (bf16 MXU) -> l2norm
# Grid: (batch_tiles,)  -- "parallel"
# ---------------------------------------------------------------------------
def img_encoder_kernel(feat_ref, w_ref, b_ref, out_ref):
    x = feat_ref[...].astype(jnp.float32)                            # (tb, img_dim)
    inv = lax.rsqrt(jnp.sum(x * x, axis=1, keepdims=True) + _EPS)    # l2norm dim=1
    xn = (x * inv).astype(jnp.bfloat16)
    y = jnp.dot(xn, w_ref[...], preferred_element_type=jnp.float32) + b_ref[...]
    inv2 = lax.rsqrt(jnp.sum(y * y, axis=1, keepdims=True) + _EPS)
    out_ref[...] = (y * inv2).astype(out_ref.dtype)


# ---------------------------------------------------------------------------
# GRU recurrence kernel (PyTorch gate order r, z, n).  Input gates gi come in
# PRE-COMPUTED (x @ W_ih + b_ih + b_hh[r,z] folded into the embedding table);
# only h @ W_hh (+ b_hn for the n gate) is done per timestep.
# Grid: (batch_tiles, time_chunks)  -- ("parallel", "arbitrary")
# (h, sel) carried in VMEM scratch across time chunks, in registers within a
# chunk; l2-normalized output written on the last chunk.
# ---------------------------------------------------------------------------
def _make_gru_kernel(bf16_gates):
    gate_dt = jnp.bfloat16 if bf16_gates else jnp.float32

    def gru_recurrence_kernel(gi_ref, lens_ref, whh_ref, bhn_ref, out_ref,
                              h_scr, sel_scr):
        tc, tb, _ = gi_ref.shape
        H = out_ref.shape[1]
        c = pl.program_id(1)

        @pl.when(c == 0)
        def _():
            h_scr[...] = jnp.zeros_like(h_scr)
            sel_scr[...] = jnp.zeros_like(sel_scr)

        whh = whh_ref[...]                                   # (H, 3H) bf16
        bhn = jnp.broadcast_to(bhn_ref[...], (tb, H))        # hoisted broadcast
        lens = lens_ref[...]                                 # (tb, 1) int32
        t_base = c * tc

        def step(i, carry):
            h, sel = carry                                   # (tb, H) f32
            gi_t = gi_ref[i].astype(jnp.float32)             # (tb, 3H) f32 add
            gh = jnp.dot(h.astype(jnp.bfloat16), whh,
                         preferred_element_type=jnp.float32)
            pre_rz = (gi_t[:, :2 * H] + gh[:, :2 * H]).astype(gate_dt)
            rz = jax.nn.sigmoid(pre_rz).astype(jnp.float32)
            r, z = rz[:, :H], rz[:, H:]
            pre_n = (gi_t[:, 2 * H:] + r * (gh[:, 2 * H:] + bhn)).astype(gate_dt)
            n = jnp.tanh(pre_n).astype(jnp.float32)
            h_new = (1.0 - z) * n + z * h
            # emulate torch.gather(out, 1, lengths-1): keep state at t == len-1
            sel_new = jnp.where(lens == t_base + i + 1, h_new, sel)
            return h_new, sel_new

        h_fin, sel_fin = lax.fori_loop(0, tc, step,
                                       (h_scr[...], sel_scr[...]), unroll=True)
        h_scr[...] = h_fin
        sel_scr[...] = sel_fin

        @pl.when(c == pl.num_programs(1) - 1)
        def _():
            sel = sel_scr[...]
            inv = lax.rsqrt(jnp.sum(sel * sel, axis=1, keepdims=True) + _EPS)
            out_ref[...] = (sel * inv).astype(out_ref.dtype)

    return gru_recurrence_kernel


# ---------------------------------------------------------------------------
# Wrappers
# ---------------------------------------------------------------------------
def encode_image(features, fc_w_bf16, fc_b, *, batch_tile=None):
    B, img_dim = features.shape
    E = fc_w_bf16.shape[1]
    tb = batch_tile or _default_batch_tile(B)
    Bp = _round_up(B, tb)
    if Bp != B:
        features = jnp.pad(features, ((0, Bp - B), (0, 0)))

    out = pl.pallas_call(
        img_encoder_kernel,
        out_shape=jax.ShapeDtypeStruct((Bp, E), jnp.float32),
        grid=(Bp // tb,),
        in_specs=[pl.BlockSpec((tb, img_dim), lambda i: (i, 0)),
                  _const_block_spec((img_dim, E), lambda i: (0, 0)),
                  _const_block_spec((1, E), lambda i: (0, 0))],
        out_specs=pl.BlockSpec((tb, E), lambda i: (i, 0)),
        compiler_params=pltpu.CompilerParams(
            dimension_semantics=("parallel",),
            vmem_limit_bytes=_vmem_limit_bytes()),
    )(features, fc_w_bf16, fc_b)
    return out[:B]


def encode_text(captions, lengths, gi_table, w_hh, b_hn,
                *, batch_tile=None, time_chunk=8, bf16_gates=None):
    B, T = captions.shape
    H = w_hh.shape[0]
    three_h = gi_table.shape[1]
    if bf16_gates is None:
        bf16_gates = _BF16_GATES_DEFAULT

    tb = batch_tile or _default_batch_tile(B)
    Bp = _round_up(B, tb)
    tc = min(time_chunk, T)
    Tp = _round_up(T, tc)

    cap = captions.astype(jnp.int32)
    lens = lengths.astype(jnp.int32)
    if Bp != B:
        cap = jnp.pad(cap, ((0, Bp - B), (0, 0)))
        lens = jnp.pad(lens, (0, Bp - B), constant_values=1)   # padded rows stay finite
    if Tp != T:
        cap = jnp.pad(cap, ((0, 0), (0, Tp - T)))

    # Input gates are a pure row-gather of the pre-folded table (bf16):
    # the T*B*D*3H projection and its f32 HBM round-trip are gone.
    gi = gi_table[cap.T]                                        # (Tp, Bp, 3H) bf16
    lens2d = lens.reshape(Bp, 1)

    out = pl.pallas_call(
        _make_gru_kernel(bf16_gates),
        out_shape=jax.ShapeDtypeStruct((Bp, H), jnp.float32),
        grid=(Bp // tb, Tp // tc),
        in_specs=[pl.BlockSpec((tc, tb, three_h), lambda b, c: (c, b, 0)),
                  pl.BlockSpec((tb, 1), lambda b, c: (b, 0)),
                  _const_block_spec((H, three_h), lambda b, c: (0, 0)),
                  _const_block_spec((1, H), lambda b, c: (0, 0))],
        out_specs=pl.BlockSpec((tb, H), lambda b, c: (b, 0)),
        scratch_shapes=[pltpu.VMEM((tb, H), jnp.float32),   # running hidden state
                        pltpu.VMEM((tb, H), jnp.float32)],  # length-gathered state
        compiler_params=pltpu.CompilerParams(
            dimension_semantics=("parallel", "arbitrary"),
            vmem_limit_bytes=_vmem_limit_bytes()),
    )(gi, lens2d, w_hh, b_hn)
    return out[:B]


def prepare_params(params):
    """One-time parameter transform.

    * fold the whole input projection into the embedding table:
        gi_table[v] = emb[v] @ W_ih + b_ih   (+ b_hh on the r,z slices)
      stored in bf16 — at runtime input gates are a row gather only.
    * keep only the n-gate slice of b_hh (it is multiplied by r in the loop).
    * cast matmul weights to bf16 (f32 accumulation is kept inside kernels).
    """
    H = params["w_hh"].shape[0]
    emb = params["emb_table"].astype(jnp.float32)
    w_ih = params["w_ih"].astype(jnp.float32)
    b_ih = params["b_ih"].astype(jnp.float32).reshape(1, -1)
    b_hh = params["b_hh"].astype(jnp.float32).reshape(1, -1)

    gi_table = emb @ w_ih + b_ih
    gi_table = gi_table.at[:, :2 * H].add(b_hh[:, :2 * H])

    return dict(
        fc_w=params["fc_w"].astype(jnp.bfloat16),
        fc_b=params["fc_b"].astype(jnp.float32).reshape(1, -1),
        gi_table=gi_table.astype(jnp.bfloat16),
        w_hh=params["w_hh"].astype(jnp.bfloat16),
        b_hn=b_hh[:, 2 * H:],
    )


def vse_forward(images, captions, lengths, prep, *, time_chunk=8):
    """VSE.forward: returns (img_emb, cap_emb)."""
    img_emb = encode_image(images, prep["fc_w"], prep["fc_b"])
    cap_emb = encode_text(captions, lengths, prep["gi_table"], prep["w_hh"],
                          prep["b_hn"], time_chunk=time_chunk)
    return img_emb, cap_emb


# ---------------------------------------------------------------------------
# Pure-JAX reference (mirrors the bf16 weight/table rounding) for sanity check
# ---------------------------------------------------------------------------
def reference_forward(images, captions, lengths, params):
    def l2n(v):
        return v * lax.rsqrt(jnp.sum(v * v, axis=1, keepdims=True) + _EPS)

    fc_w = params["fc_w"].astype(jnp.bfloat16).astype(jnp.float32)
    x = l2n(images).astype(jnp.bfloat16).astype(jnp.float32)
    img = l2n(x @ fc_w + params["fc_b"].reshape(1, -1))

    H = params["w_hh"].shape[0]
    b_ih = params["b_ih"].astype(jnp.float32).reshape(1, -1)
    b_hh = params["b_hh"].astype(jnp.float32).reshape(1, -1)
    gi_table = params["emb_table"] @ params["w_ih"] + b_ih
    gi_table = gi_table.at[:, :2 * H].add(b_hh[:, :2 * H])
    gi_table = gi_table.astype(jnp.bfloat16).astype(jnp.float32)
    b_hn = b_hh[:, 2 * H:]
    w_hh = params["w_hh"].astype(jnp.bfloat16).astype(jnp.float32)

    B, T = captions.shape
    h = jnp.zeros((B, H), jnp.float32)
    sel = jnp.zeros((B, H), jnp.float32)
    for t in range(T):
        gi = gi_table[captions[:, t]]
        gh = h.astype(jnp.bfloat16).astype(jnp.float32) @ w_hh
        r = jax.nn.sigmoid(gi[:, :H] + gh[:, :H])
        z = jax.nn.sigmoid(gi[:, H:2 * H] + gh[:, H:2 * H])
        n = jnp.tanh(gi[:, 2 * H:] + r * (gh[:, 2 * H:] + b_hn))
        h = (1.0 - z) * n + z * h
        sel = jnp.where(lengths[:, None] == (t + 1), h, sel)
    return img, l2n(sel)


# ---------------------------------------------------------------------------
# Deterministic parameter init + example run
# ---------------------------------------------------------------------------
if __name__ == "__main__":
    key = jax.random.PRNGKey(0)
    keys = jax.random.split(key, 8)

    # small stand-ins for (img_dim=2048, word_dim=300, embed_size=1024)
    B, T = 8, 8
    vocab_size, word_dim, embed_size, img_dim = 50, 32, 128, 256

    # fc: Xavier-uniform as in EncoderImageFull.init_weights, bias = 0
    r = (6.0 ** 0.5) / ((img_dim + embed_size) ** 0.5)
    fc_w = jax.random.uniform(keys[0], (img_dim, embed_size), jnp.float32, -r, r)
    fc_b = jnp.zeros((1, embed_size), jnp.float32)

    # embedding + GRU weights (deterministic synthetic init)
    emb_table = jax.random.uniform(keys[1], (vocab_size, word_dim), jnp.float32, -0.1, 0.1)
    s = 1.0 / (embed_size ** 0.5)
    w_ih = jax.random.uniform(keys[2], (word_dim, 3 * embed_size), jnp.float32, -s, s)
    w_hh = jax.random.uniform(keys[3], (embed_size, 3 * embed_size), jnp.float32, -s, s)
    b_ih = jax.random.uniform(keys[4], (1, 3 * embed_size), jnp.float32, -s, s)
    b_hh = jax.random.uniform(keys[5], (1, 3 * embed_size), jnp.float32, -s, s)

    params = dict(fc_w=fc_w, fc_b=fc_b, emb_table=emb_table,
                  w_ih=w_ih, w_hh=w_hh, b_ih=b_ih, b_hh=b_hh)
    prep = prepare_params(params)

    # inputs
    images = jax.random.normal(keys[6], (B, img_dim), jnp.float32)     # CNN features
    captions = jax.random.randint(keys[7], (B, T), 0, vocab_size, jnp.int32)
    lengths = jnp.array([8, 7, 7, 6, 5, 4, 3, 2], jnp.int32)           # sorted desc

    fwd = jax.jit(lambda im, cp, ln, pp: vse_forward(im, cp, ln, pp))
    img_emb, cap_emb = fwd(images, captions, lengths, prep)
    img_emb, cap_emb = jax.block_until_ready((img_emb, cap_emb))

    assert img_emb.shape == (B, embed_size) and cap_emb.shape == (B, embed_size)
    assert bool(jnp.all(jnp.isfinite(img_emb))) and bool(jnp.all(jnp.isfinite(cap_emb)))
    # rows are L2-normalized
    assert bool(jnp.allclose(jnp.linalg.norm(img_emb, axis=1), 1.0, atol=1e-4))
    assert bool(jnp.allclose(jnp.linalg.norm(cap_emb, axis=1), 1.0, atol=1e-4))

    # correctness vs pure-JAX reference (bf16 weights/gates => relaxed tolerance)
    img_ref, cap_ref = reference_forward(images, captions, lengths, params)
    assert bool(jnp.max(jnp.abs(img_emb - img_ref)) < 5e-2)
    assert bool(jnp.max(jnp.abs(cap_emb - cap_ref)) < 5e-2)

    print("KERNEL_OK")
</pallas_src>

<mosaic_0001>
module attributes {stable_mosaic.version = 11 : i64} {
  func.func @img_encoder_kernel(%arg0: i32, %arg1: memref<8x256xf32, #tpu.memory_space<vmem>>, %arg2: memref<256x128xbf16, #tpu.memory_space<vmem>>, %arg3: memref<1x128xf32, #tpu.memory_space<vmem>>, %arg4: memref<8x128xf32, #tpu.memory_space<vmem>>) attributes {dimension_semantics = [#tpu.dimension_semantics<parallel>], iteration_bounds = array<i64: 1>, scalar_prefetch = 0 : i64, scratch_operands = 0 : i64, tpu.core_type = #tpu.core_type<tc>, window_params = [{transform_indices = @transform_0, window_bounds = array<i64: 8, 256>}, {pipeline_mode = #tpu.pipeline_mode<synchronous>, transform_indices = @transform_1, window_bounds = array<i64: 256, 128>}, {pipeline_mode = #tpu.pipeline_mode<synchronous>, transform_indices = @transform_2, window_bounds = array<i64: 1, 128>}, {transform_indices = @transform_3, window_bounds = array<i64: 8, 128>}]} {
    %c0 = arith.constant 0 : index
    %c0_0 = arith.constant 0 : index
    %0 = vector.load %arg1[%c0, %c0_0] : memref<8x256xf32, #tpu.memory_space<vmem>>, vector<8x256xf32>
    %1 = arith.mulf %0, %0 : vector<8x256xf32>
    %cst = arith.constant dense<0.000000e+00> : vector<8xf32>
    %2 = vector.multi_reduction <add>, %1, %cst [1] : vector<8x256xf32> to vector<8xf32>
    %3 = vector.shape_cast %2 : vector<8xf32> to vector<8x1xf32>
    %cst_1 = arith.constant 9.99999996E-13 : f32
    %4 = vector.broadcast %cst_1 : f32 to vector<8x1xf32>
    %5 = arith.addf %3, %4 : vector<8x1xf32>
    %6 = math.rsqrt %5 : vector<8x1xf32>
    %7 = vector.broadcast %6 : vector<8x1xf32> to vector<8x256xf32>
    %8 = arith.mulf %0, %7 : vector<8x256xf32>
    %9 = arith.truncf %8 : vector<8x256xf32> to vector<8x256xbf16>
    %c0_2 = arith.constant 0 : index
    %c0_3 = arith.constant 0 : index
    %10 = vector.load %arg2[%c0_2, %c0_3] : memref<256x128xbf16, #tpu.memory_space<vmem>>, vector<256x128xbf16>
    %cst_4 = arith.constant dense<0.000000e+00> : vector<8x128xf32>
    %11 = tpu.matmul %9, %10, %cst_4 {dimension_numbers = #tpu.dot_dimension_numbers<[1], [0], [0], [1], [0, 0, 1, 1], [], []>} : vector<8x256xbf16>, vector<256x128xbf16>, vector<8x128xf32> -> vector<8x128xf32>
    %c0_5 = arith.constant 0 : index
    %c0_6 = arith.constant 0 : index
    %12 = vector.load %arg3[%c0_5, %c0_6] : memref<1x128xf32, #tpu.memory_space<vmem>>, vector<1x128xf32>
    %13 = vector.broadcast %12 : vector<1x128xf32> to vector<8x128xf32>
    %14 = arith.addf %11, %13 : vector<8x128xf32>
    %15 = arith.mulf %14, %14 : vector<8x128xf32>
    %cst_7 = arith.constant dense<0.000000e+00> : vector<8xf32>
    %16 = vector.multi_reduction <add>, %15, %cst_7 [1] : vector<8x128xf32> to vector<8xf32>
    %17 = vector.shape_cast %16 : vector<8xf32> to vector<8x1xf32>
    %cst_8 = arith.constant 9.99999996E-13 : f32
    %18 = vector.broadcast %cst_8 : f32 to vector<8x1xf32>
    %19 = arith.addf %17, %18 : vector<8x1xf32>
    %20 = math.rsqrt %19 : vector<8x1xf32>
    %21 = vector.broadcast %20 : vector<8x1xf32> to vector<8x128xf32>
    %22 = arith.mulf %14, %21 : vector<8x128xf32>
    %c0_9 = arith.constant 0 : index
    %c0_10 = arith.constant 0 : index
    %23 = vector.load %arg4[%c0_9, %c0_10] : memref<8x128xf32, #tpu.memory_space<vmem>>, vector<8x128xf32>
    tpu.vector_store %arg4[%c0_9, %c0_10], %22 {strides = array<i32>} : memref<8x128xf32, #tpu.memory_space<vmem>>, vector<8x128xf32>,
    return
  }
  func.func @transform_0(%arg0: i32) -> (i32, i32) {
    %c0_i32 = arith.constant 0 : i32
    %c0_i32_0 = arith.constant 0 : i32
    return %arg0, %c0_i32 : i32, i32
  }
  func.func @transform_1(%arg0: i32) -> (i32, i32) {
    %c0_i32 = arith.constant 0 : i32
    %c0_i32_0 = arith.constant 0 : i32
    %c0_i32_1 = arith.constant 0 : i32
    return %c0_i32, %c0_i32_0 : i32, i32
  }
  func.func @transform_2(%arg0: i32) -> (i32, i32) {
    %c0_i32 = arith.constant 0 : i32
    %c0_i32_0 = arith.constant 0 : i32
    %c0_i32_1 = arith.constant 0 : i32
    return %c0_i32, %c0_i32_0 : i32, i32
  }
  func.func @transform_3(%arg0: i32) -> (i32, i32) {
    %c0_i32 = arith.constant 0 : i32
    %c0_i32_0 = arith.constant 0 : i32
    return %arg0, %c0_i32 : i32, i32
  }
}

module attributes {stable_mosaic.version = 11 : i64} {
  func.func @gru_recurrence_kernel(%arg0: i32, %arg1: i32, %arg2: memref<8x8x384xbf16, #tpu.memory_space<vmem>>, %arg3: memref<8x1xi32, #tpu.memory_space<vmem>>, %arg4: memref<128x384xbf16, #tpu.memory_space<vmem>>, %arg5: memref<1x128xf32, #tpu.memory_space<vmem>>, %arg6: memref<8x128xf32, #tpu.memory_space<vmem>>, %arg7: memref<8x128xf32, #tpu.memory_space<vmem>>, %arg8: memref<8x128xf32, #tpu.memory_space<vmem>>) attributes {dimension_semantics = [#tpu.dimension_semantics<parallel>, #tpu.dimension_semantics<arbitrary>], iteration_bounds = array<i64: 1, 1>, scalar_prefetch = 0 : i64, scratch_operands = 2 : i64, tpu.core_type = #tpu.core_type<tc>, window_params = [{transform_indices = @transform_0, window_bounds = array<i64: 8, 8, 384>}, {transform_indices = @transform_1, window_bounds = array<i64: 8, 1>}, {pipeline_mode = #tpu.pipeline_mode<synchronous>, transform_indices = @transform_2, window_bounds = array<i64: 128, 384>}, {pipeline_mode = #tpu.pipeline_mode<synchronous>, transform_indices = @transform_3, window_bounds = array<i64: 1, 128>}, {transform_indices = @transform_4, window_bounds = array<i64: 8, 128>}]} {
    %c0_i32 = arith.constant 0 : i32
    %0 = arith.cmpi eq, %arg1, %c0_i32 : i32
    %1 = arith.extui %0 : i1 to i32
    %c0_i32_0 = arith.constant 0 : i32
    %2 = arith.cmpi ne, %1, %c0_i32_0 : i32
    scf.if %2 {
      %cst_65 = arith.constant 0.000000e+00 : f32
      %320 = vector.broadcast %cst_65 : f32 to vector<8x128xf32>
      %c0_66 = arith.constant 0 : index
      %c0_67 = arith.constant 0 : index
      %321 = vector.load %arg7[%c0_66, %c0_67] : memref<8x128xf32, #tpu.memory_space<vmem>>, vector<8x128xf32>
      tpu.vector_store %arg7[%c0_66, %c0_67], %320 {strides = array<i32>} : memref<8x128xf32, #tpu.memory_space<vmem>>, vector<8x128xf32>,
      %cst_68 = arith.constant 0.000000e+00 : f32
      %322 = vector.broadcast %cst_68 : f32 to vector<8x128xf32>
      %c0_69 = arith.constant 0 : index
      %c0_70 = arith.constant 0 : index
      %323 = vector.load %arg8[%c0_69, %c0_70] : memref<8x128xf32, #tpu.memory_space<vmem>>, vector<8x128xf32>
      tpu.vector_store %arg8[%c0_69, %c0_70], %322 {strides = array<i32>} : memref<8x128xf32, #tpu.memory_space<vmem>>, vector<8x128xf32>,
    } else {
    }
    %c0 = arith.constant 0 : index
    %c0_1 = arith.constant 0 : index
    %3 = vector.load %arg4[%c0, %c0_1] : memref<128x384xbf16, #tpu.memory_space<vmem>>, vector<128x384xbf16>
    %c0_2 = arith.constant 0 : index
    %c0_3 = arith.constant 0 : index
    %4 = vector.load %arg5[%c0_2, %c0_3] : memref<1x128xf32, #tpu.memory_space<vmem>>, vector<1x128xf32>
    %5 = vector.shape_cast %4 : vector<1x128xf32> to vector<1x128xf32>
    %6 = vector.broadcast %5 : vector<1x128xf32> to vector<8x128xf32>
    %c0_4 = arith.constant 0 : index
    %c0_5 = arith.constant 0 : index
    %7 = vector.load %arg3[%c0_4, %c0_5] : memref<8x1xi32, #tpu.memory_space<vmem>>, vector<8x1xi32>
    %c8_i32 = arith.constant 8 : i32
    %8 = arith.muli %arg1, %c8_i32 : i32
    %c0_6 = arith.constant 0 : index
    %c0_7 = arith.constant 0 : index
    %9 = vector.load %arg7[%c0_6, %c0_7] : memref<8x128xf32, #tpu.memory_space<vmem>>, vector<8x128xf32>
    %c0_8 = arith.constant 0 : index
    %c0_9 = arith.constant 0 : index
    %10 = vector.load %arg8[%c0_8, %c0_9] : memref<8x128xf32, #tpu.memory_space<vmem>>, vector<8x128xf32>
    %c0_i32_10 = arith.constant 0 : i32
    %11 = arith.index_cast %c0_i32_10 : i32 to index
    %c0_11 = arith.constant 0 : index
    %c0_12 = arith.constant 0 : index
    %12 = vector.load %arg2[%11, %c0_11, %c0_12] : memref<8x8x384xbf16, #tpu.memory_space<vmem>>, vector<1x8x384xbf16>
    %13 = vector.shape_cast %12 : vector<1x8x384xbf16> to vector<8x384xbf16>
    %14 = arith.extf %13 : vector<8x384xbf16> to vector<8x384xf32>
    %15 = arith.truncf %9 : vector<8x128xf32> to vector<8x128xbf16>
    %cst = arith.constant dense<0.000000e+00> : vector<8x384xf32>
    %16 = tpu.matmul %15, %3, %cst {dimension_numbers = #tpu.dot_dimension_numbers<[1], [0], [0], [1], [0, 0, 1, 1], [], []>} : vector<8x128xbf16>, vector<128x384xbf16>, vector<8x384xf32> -> vector<8x384xf32>
    %17 = vector.extract_strided_slice %14 {offsets = [0, 0], sizes = [8, 256], strides = [1, 1]} : vector<8x384xf32> to vector<8x256xf32>
    %18 = vector.extract_strided_slice %16 {offsets = [0, 0], sizes = [8, 256], strides = [1, 1]} : vector<8x384xf32> to vector<8x256xf32>
    %19 = arith.addf %17, %18 : vector<8x256xf32>
    %20 = arith.truncf %19 : vector<8x256xf32> to vector<8x256xbf16>
    %21 = arith.negf %20 : vector<8x256xbf16>
    %22 = math.exp %21 : vector<8x256xbf16>
    %cst_13 = arith.constant 1.000000e+00 : bf16
    %23 = vector.broadcast %cst_13 : bf16 to vector<8x256xbf16>
    %24 = arith.addf %23, %22 : vector<8x256xbf16>
    %25 = arith.divf %23, %24 : vector<8x256xbf16>
    %26 = arith.extf %25 : vector<8x256xbf16> to vector<8x256xf32>
    %27 = vector.extract_strided_slice %26 {offsets = [0, 0], sizes = [8, 128], strides = [1, 1]} : vector<8x256xf32> to vector<8x128xf32>
    %28 = vector.extract_strided_slice %26 {offsets = [0, 128], sizes = [8, 128], strides = [1, 1]} : vector<8x256xf32> to vector<8x128xf32>
    %29 = vector.extract_strided_slice %14 {offsets = [0, 256], sizes = [8, 128], strides = [1, 1]} : vector<8x384xf32> to vector<8x128xf32>
    %30 = vector.extract_strided_slice %16 {offsets = [0, 256], sizes = [8, 128], strides = [1, 1]} : vector<8x384xf32> to vector<8x128xf32>
    %31 = arith.addf %30, %6 : vector<8x128xf32>
    %32 = arith.mulf %27, %31 : vector<8x128xf32>
    %33 = arith.addf %29, %32 : vector<8x128xf32>
    %34 = arith.truncf %33 : vector<8x128xf32> to vector<8x128xbf16>
    %35 = math.tanh %34 : vector<8x128xbf16>
    %36 = arith.extf %35 : vector<8x128xbf16> to vector<8x128xf32>
    %cst_14 = arith.constant 1.000000e+00 : f32
    %37 = vector.broadcast %cst_14 : f32 to vector<8x128xf32>
    %38 = arith.subf %37, %28 : vector<8x128xf32>
    %39 = arith.mulf %38, %36 : vector<8x128xf32>
    %40 = arith.mulf %28, %9 : vector<8x128xf32>
    %41 = arith.addf %39, %40 : vector<8x128xf32>
    %42 = arith.addi %8, %c0_i32_10 : i32
    %c1_i32 = arith.constant 1 : i32
    %43 = arith.addi %42, %c1_i32 : i32
    %44 = vector.broadcast %43 : i32 to vector<8x1xi32>
    %45 = arith.cmpi eq, %7, %44 : vector<8x1xi32>
    %46 = vector.shape_cast %45 : vector<8x1xi1> to vector<8x1xi1>
    %47 = vector.broadcast %46 : vector<8x1xi1> to vector<8x128xi1>
    %48 = arith.select %47, %41, %10 : vector<8x128xi1>, vector<8x128xf32>
    %c1_i32_15 = arith.constant 1 : i32
    %49 = arith.index_cast %c1_i32_15 : i32 to index
    %c0_16 = arith.constant 0 : index
    %c0_17 = arith.constant 0 : index
    %50 = vector.load %arg2[%49, %c0_16, %c0_17] : memref<8x8x384xbf16, #tpu.memory_space<vmem>>, vector<1x8x384xbf16>
    %51 = vector.shape_cast %50 : vector<1x8x384xbf16> to vector<8x384xbf16>
    %52 = arith.extf %51 : vector<8x384xbf16> to vector<8x384xf32>
    %53 = arith.truncf %41 : vector<8x128xf32> to vector<8x128xbf16>
    %cst_18 = arith.constant dense<0.000000e+00> : vector<8x384xf32>
    %54 = tpu.matmul %53, %3, %cst_18 {dimension_numbers = #tpu.dot_dimension_numbers<[1], [0], [0], [1], [0, 0, 1, 1], [], []>} : vector<8x128xbf16>, vector<128x384xbf16>, vector<8x384xf32> -> vector<8x384xf32>
    %55 = vector.extract_strided_slice %52 {offsets = [0, 0], sizes = [8, 256], strides = [1, 1]} : vector<8x384xf32> to vector<8x256xf32>
    %56 = vector.extract_strided_slice %54 {offsets = [0, 0], sizes = [8, 256], strides = [1, 1]} : vector<8x384xf32> to vector<8x256xf32>
    %57 = arith.addf %55, %56 : vector<8x256xf32>
    %58 = arith.truncf %57 : vector<8x256xf32> to vector<8x256xbf16>
    %59 = arith.negf %58 : vector<8x256xbf16>
    %60 = math.exp %59 : vector<8x256xbf16>
    %cst_19 = arith.constant 1.000000e+00 : bf16
    %61 = vector.broadcast %cst_19 : bf16 to vector<8x256xbf16>
    %62 = arith.addf %61, %60 : vector<8x256xbf16>
    %63 = arith.divf %61, %62 : vector<8x256xbf16>
    %64 = arith.extf %63 : vector<8x256xbf16> to vector<8x256xf32>
    %65 = vector.extract_strided_slice %64 {offsets = [0, 0], sizes = [8, 128], strides = [1, 1]} : vector<8x256xf32> to vector<8x128xf32>
    %66 = vector.extract_strided_slice %64 {offsets = [0, 128], sizes = [8, 128], strides = [1, 1]} : vector<8x256xf32> to vector<8x128xf32>
    %67 = vector.extract_strided_slice %52 {offsets = [0, 256], sizes = [8, 128], strides = [1, 1]} : vector<8x384xf32> to vector<8x128xf32>
    %68 = vector.extract_strided_slice %54 {offsets = [0, 256], sizes = [8, 128], strides = [1, 1]} : vector<8x384xf32> to vector<8x128xf32>
    %69 = arith.addf %68, %6 : vector<8x128xf32>
    %70 = arith.mulf %65, %69 : vector<8x128xf32>
    %71 = arith.addf %67, %70 : vector<8x128xf32>
    %72 = arith.truncf %71 : vector<8x128xf32> to vector<8x128xbf16>
    %73 = math.tanh %72 : vector<8x128xbf16>
    %74 = arith.extf %73 : vector<8x128xbf16> to vector<8x128xf32>
    %cst_20 = arith.constant 1.000000e+00 : f32
    %75 = vector.broadcast %cst_20 : f32 to vector<8x128xf32>
    %76 = arith.subf %75, %66 : vector<8x128xf32>
    %77 = arith.mulf %76, %74 : vector<8x128xf32>
    %78 = arith.mulf %66, %41 : vector<8x128xf32>
    %79 = arith.addf %77, %78 : vector<8x128xf32>
    %80 = arith.addi %8, %c1_i32_15 : i32
    %c1_i32_21 = arith.constant 1 : i32
    %81 = arith.addi %80, %c1_i32_21 : i32
    %82 = vector.broadcast %81 : i32 to vector<8x1xi32>
    %83 = arith.cmpi eq, %7, %82 : vector<8x1xi32>
    %84 = vector.shape_cast %83 : vector<8x1xi1> to vector<8x1xi1>
    %85 = vector.broadcast %84 : vector<8x1xi1> to vector<8x128xi1>
    %86 = arith.select %85, %79, %48 : vector<8x128xi1>, vector<8x128xf32>
    %c2_i32 = arith.constant 2 : i32
    %87 = arith.index_cast %c2_i32 : i32 to index
    %c0_22 = arith.constant 0 : index
    %c0_23 = arith.constant 0 : index
    %88 = vector.load %arg2[%87, %c0_22, %c0_23] : memref<8x8x384xbf16, #tpu.memory_space<vmem>>, vector<1x8x384xbf16>
    %89 = vector.shape_cast %88 : vector<1x8x384xbf16> to vector<8x384xbf16>
    %90 = arith.extf %89 : vector<8x384xbf16> to vector<8x384xf32>
    %91 = arith.truncf %79 : vector<8x128xf32> to vector<8x128xbf16>
    %cst_24 = arith.constant dense<0.000000e+00> : vector<8x384xf32>
    %92 = tpu.matmul %91, %3, %cst_24 {dimension_numbers = #tpu.dot_dimension_numbers<[1], [0], [0], [1], [0, 0, 1, 1], [], []>} : vector<8x128xbf16>, vector<128x384xbf16>, vector<8x384xf32> -> vector<8x384xf32>
    %93 = vector.extract_strided_slice %90 {offsets = [0, 0], sizes = [8, 256], strides = [1, 1]} : vector<8x384xf32> to vector<8x256xf32>
    %94 = vector.extract_strided_slice %92 {offsets = [0, 0], sizes = [8, 256], strides = [1, 1]} : vector<8x384xf32> to vector<8x256xf32>
    %95 = arith.addf %93, %94 : vector<8x256xf32>
    %96 = arith.truncf %95 : vector<8x256xf32> to vector<8x256xbf16>
    %97 = arith.negf %96 : vector<8x256xbf16>
    %98 = math.exp %97 : vector<8x256xbf16>
    %cst_25 = arith.constant 1.000000e+00 : bf16
    %99 = vector.broadcast %cst_25 : bf16 to vector<8x256xbf16>
    %100 = arith.addf %99, %98 : vector<8x256xbf16>
    %101 = arith.divf %99, %100 : vector<8x256xbf16>
    %102 = arith.extf %101 : vector<8x256xbf16> to vector<8x256xf32>
    %103 = vector.extract_strided_slice %102 {offsets = [0, 0], sizes = [8, 128], strides = [1, 1]} : vector<8x256xf32> to vector<8x128xf32>
    %104 = vector.extract_strided_slice %102 {offsets = [0, 128], sizes = [8, 128], strides = [1, 1]} : vector<8x256xf32> to vector<8x128xf32>
    %105 = vector.extract_strided_slice %90 {offsets = [0, 256], sizes = [8, 128], strides = [1, 1]} : vector<8x384xf32> to vector<8x128xf32>
    %106 = vector.extract_strided_slice %92 {offsets = [0, 256], sizes = [8, 128], strides = [1, 1]} : vector<8x384xf32> to vector<8x128xf32>
    %107 = arith.addf %106, %6 : vector<8x128xf32>
    %108 = arith.mulf %103, %107 : vector<8x128xf32>
    %109 = arith.addf %105, %108 : vector<8x128xf32>
    %110 = arith.truncf %109 : vector<8x128xf32> to vector<8x128xbf16>
    %111 = math.tanh %110 : vector<8x128xbf16>
    %112 = arith.extf %111 : vector<8x128xbf16> to vector<8x128xf32>
    %cst_26 = arith.constant 1.000000e+00 : f32
    %113 = vector.broadcast %cst_26 : f32 to vector<8x128xf32>
    %114 = arith.subf %113, %104 : vector<8x128xf32>
    %115 = arith.mulf %114, %112 : vector<8x128xf32>
    %116 = arith.mulf %104, %79 : vector<8x128xf32>
    %117 = arith.addf %115, %116 : vector<8x128xf32>
    %118 = arith.addi %8, %c2_i32 : i32
    %c1_i32_27 = arith.constant 1 : i32
    %119 = arith.addi %118, %c1_i32_27 : i32
    %120 = vector.broadcast %119 : i32 to vector<8x1xi32>
    %121 = arith.cmpi eq, %7, %120 : vector<8x1xi32>
    %122 = vector.shape_cast %121 : vector<8x1xi1> to vector<8x1xi1>
    %123 = vector.broadcast %122 : vector<8x1xi1> to vector<8x128xi1>
    %124 = arith.select %123, %117, %86 : vector<8x128xi1>, vector<8x128xf32>
    %c3_i32 = arith.constant 3 : i32
    %125 = arith.index_cast %c3_i32 : i32 to index
    %c0_28 = arith.constant 0 : index
    %c0_29 = arith.constant 0 : index
    %126 = vector.load %arg2[%125, %c0_28, %c0_29] : memref<8x8x384xbf16, #tpu.memory_space<vmem>>, vector<1x8x384xbf16>
    %127 = vector.shape_cast %126 : vector<1x8x384xbf16> to vector<8x384xbf16>
    %128 = arith.extf %127 : vector<8x384xbf16> to vector<8x384xf32>
    %129 = arith.truncf %117 : vector<8x128xf32> to vector<8x128xbf16>
    %cst_30 = arith.constant dense<0.000000e+00> : vector<8x384xf32>
    %130 = tpu.matmul %129, %3, %cst_30 {dimension_numbers = #tpu.dot_dimension_numbers<[1], [0], [0], [1], [0, 0, 1, 1], [], []>} : vector<8x128xbf16>, vector<128x384xbf16>, vector<8x384xf32> -> vector<8x384xf32>
    %131 = vector.extract_strided_slice %128 {offsets = [0, 0], sizes = [8, 256], strides = [1, 1]} : vector<8x384xf32> to vector<8x256xf32>
    %132 = vector.extract_strided_slice %130 {offsets = [0, 0], sizes = [8, 256], strides = [1, 1]} : vector<8x384xf32> to vector<8x256xf32>
    %133 = arith.addf %131, %132 : vector<8x256xf32>
    %134 = arith.truncf %133 : vector<8x256xf32> to vector<8x256xbf16>
    %135 = arith.negf %134 : vector<8x256xbf16>
    %136 = math.exp %135 : vector<8x256xbf16>
    %cst_31 = arith.constant 1.000000e+00 : bf16
    %137 = vector.broadcast %cst_31 : bf16 to vector<8x256xbf16>
    %138 = arith.addf %137, %136 : vector<8x256xbf16>
    %139 = arith.divf %137, %138 : vector<8x256xbf16>
    %140 = arith.extf %139 : vector<8x256xbf16> to vector<8x256xf32>
    %141 = vector.extract_strided_slice %140 {offsets = [0, 0], sizes = [8, 128], strides = [1, 1]} : vector<8x256xf32> to vector<8x128xf32>
    %142 = vector.extract_strided_slice %140 {offsets = [0, 128], sizes = [8, 128], strides = [1, 1]} : vector<8x256xf32> to vector<8x128xf32>
    %143 = vector.extract_strided_slice %128 {offsets = [0, 256], sizes = [8, 128], strides = [1, 1]} : vector<8x384xf32> to vector<8x128xf32>
    %144 = vector.extract_strided_slice %130 {offsets = [0, 256], sizes = [8, 128], strides = [1, 1]} : vector<8x384xf32> to vector<8x128xf32>
    %145 = arith.addf %144, %6 : vector<8x128xf32>
    %146 = arith.mulf %141, %145 : vector<8x128xf32>
    %147 = arith.addf %143, %146 : vector<8x128xf32>
    %148 = arith.truncf %147 : vector<8x128xf32> to vector<8x128xbf16>
    %149 = math.tanh %148 : vector<8x128xbf16>
    %150 = arith.extf %149 : vector<8x128xbf16> to vector<8x128xf32>
    %cst_32 = arith.constant 1.000000e+00 : f32
    %151 = vector.broadcast %cst_32 : f32 to vector<8x128xf32>
    %152 = arith.subf %151, %142 : vector<8x128xf32>
    %153 = arith.mulf %152, %150 : vector<8x128xf32>
    %154 = arith.mulf %142, %117 : vector<8x128xf32>
    %155 = arith.addf %153, %154 : vector<8x128xf32>
    %156 = arith.addi %8, %c3_i32 : i32
    %c1_i32_33 = arith.constant 1 : i32
    %157 = arith.addi %156, %c1_i32_33 : i32
    %158 = vector.broadcast %157 : i32 to vector<8x1xi32>
    %159 = arith.cmpi eq, %7, %158 : vector<8x1xi32>
    %160 = vector.shape_cast %159 : vector<8x1xi1> to vector<8x1xi1>
    %161 = vector.broadcast %160 : vector<8x1xi1> to vector<8x128xi1>
    %162 = arith.select %161, %155, %124 : vector<8x128xi1>, vector<8x128xf32>
    %c4_i32 = arith.constant 4 : i32
    %163 = arith.index_cast %c4_i32 : i32 to index
    %c0_34 = arith.constant 0 : index
    %c0_35 = arith.constant 0 : index
    %164 = vector.load %arg2[%163, %c0_34, %c0_35] : memref<8x8x384xbf16, #tpu.memory_space<vmem>>, vector<1x8x384xbf16>
    %165 = vector.shape_cast %164 : vector<1x8x384xbf16> to vector<8x384xbf16>
    %166 = arith.extf %165 : vector<8x384xbf16> to vector<8x384xf32>
    %167 = arith.truncf %155 : vector<8x128xf32> to vector<8x128xbf16>
    %cst_36 = arith.constant dense<0.000000e+00> : vector<8x384xf32>
    %168 = tpu.matmul %167, %3, %cst_36 {dimension_numbers = #tpu.dot_dimension_numbers<[1], [0], [0], [1], [0, 0, 1, 1], [], []>} : vector<8x128xbf16>, vector<128x384xbf16>, vector<8x384xf32> -> vector<8x384xf32>
    %169 = vector.extract_strided_slice %166 {offsets = [0, 0], sizes = [8, 256], strides = [1, 1]} : vector<8x384xf32> to vector<8x256xf32>
    %170 = vector.extract_strided_slice %168 {offsets = [0, 0], sizes = [8, 256], strides = [1, 1]} : vector<8x384xf32> to vector<8x256xf32>
    %171 = arith.addf %169, %170 : vector<8x256xf32>
    %172 = arith.truncf %171 : vector<8x256xf32> to vector<8x256xbf16>
    %173 = arith.negf %172 : vector<8x256xbf16>
    %174 = math.exp %173 : vector<8x256xbf16>
    %cst_37 = arith.constant 1.000000e+00 : bf16
    %175 = vector.broadcast %cst_37 : bf16 to vector<8x256xbf16>
    %176 = arith.addf %175, %174 : vector<8x256xbf16>
    %177 = arith.divf %175, %176 : vector<8x256xbf16>
    %178 = arith.extf %177 : vector<8x256xbf16> to vector<8x256xf32>
    %179 = vector.extract_strided_slice %178 {offsets = [0, 0], sizes = [8, 128], strides = [1, 1]} : vector<8x256xf32> to vector<8x128xf32>
    %180 = vector.extract_strided_slice %178 {offsets = [0, 128], sizes = [8, 128], strides = [1, 1]} : vector<8x256xf32> to vector<8x128xf32>
    %181 = vector.extract_strided_slice %166 {offsets = [0, 256], sizes = [8, 128], strides = [1, 1]} : vector<8x384xf32> to vector<8x128xf32>
    %182 = vector.extract_strided_slice %168 {offsets = [0, 256], sizes = [8, 128], strides = [1, 1]} : vector<8x384xf32> to vector<8x128xf32>
    %183 = arith.addf %182, %6 : vector<8x128xf32>
    %184 = arith.mulf %179, %183 : vector<8x128xf32>
    %185 = arith.addf %181, %184 : vector<8x128xf32>
    %186 = arith.truncf %185 : vector<8x128xf32> to vector<8x128xbf16>
    %187 = math.tanh %186 : vector<8x128xbf16>
    %188 = arith.extf %187 : vector<8x128xbf16> to vector<8x128xf32>
    %cst_38 = arith.constant 1.000000e+00 : f32
    %189 = vector.broadcast %cst_38 : f32 to vector<8x128xf32>
    %190 = arith.subf %189, %180 : vector<8x128xf32>
    %191 = arith.mulf %190, %188 : vector<8x128xf32>
    %192 = arith.mulf %180, %155 : vector<8x128xf32>
    %193 = arith.addf %191, %192 : vector<8x128xf32>
    %194 = arith.addi %8, %c4_i32 : i32
    %c1_i32_39 = arith.constant 1 : i32
    %195 = arith.addi %194, %c1_i32_39 : i32
    %196 = vector.broadcast %195 : i32 to vector<8x1xi32>
    %197 = arith.cmpi eq, %7, %196 : vector<8x1xi32>
    %198 = vector.shape_cast %197 : vector<8x1xi1> to vector<8x1xi1>
    %199 = vector.broadcast %198 : vector<8x1xi1> to vector<8x128xi1>
    %200 = arith.select %199, %193, %162 : vector<8x128xi1>, vector<8x128xf32>
    %c5_i32 = arith.constant 5 : i32
    %201 = arith.index_cast %c5_i32 : i32 to index
    %c0_40 = arith.constant 0 : index
    %c0_41 = arith.constant 0 : index
    %202 = vector.load %arg2[%201, %c0_40, %c0_41] : memref<8x8x384xbf16, #tpu.memory_space<vmem>>, vector<1x8x384xbf16>
    %203 = vector.shape_cast %202 : vector<1x8x384xbf16> to vector<8x384xbf16>
    %204 = arith.extf %203 : vector<8x384xbf16> to vector<8x384xf32>
    %205 = arith.truncf %193 : vector<8x128xf32> to vector<8x128xbf16>
    %cst_42 = arith.constant dense<0.000000e+00> : vector<8x384xf32>
    %206 = tpu.matmul %205, %3, %cst_42 {dimension_numbers = #tpu.dot_dimension_numbers<[1], [0], [0], [1], [0, 0, 1, 1], [], []>} : vector<8x128xbf16>, vector<128x384xbf16>, vector<8x384xf32> -> vector<8x384xf32>
    %207 = vector.extract_strided_slice %204 {offsets = [0, 0], sizes = [8, 256], strides = [1, 1]} : vector<8x384xf32> to vector<8x256xf32>
    %208 = vector.extract_strided_slice %206 {offsets = [0, 0], sizes = [8, 256], strides = [1, 1]} : vector<8x384xf32> to vector<8x256xf32>
    %209 = arith.addf %207, %208 : vector<8x256xf32>
    %210 = arith.truncf %209 : vector<8x256xf32> to vector<8x256xbf16>
    %211 = arith.negf %210 : vector<8x256xbf16>
    %212 = math.exp %211 : vector<8x256xbf16>
    %cst_43 = arith.constant 1.000000e+00 : bf16
    %213 = vector.broadcast %cst_43 : bf16 to vector<8x256xbf16>
    %214 = arith.addf %213, %212 : vector<8x256xbf16>
    %215 = arith.divf %213, %214 : vector<8x256xbf16>
    %216 = arith.extf %215 : vector<8x256xbf16> to vector<8x256xf32>
    %217 = vector.extract_strided_slice %216 {offsets = [0, 0], sizes = [8, 128], strides = [1, 1]} : vector<8x256xf32> to vector<8x128xf32>
    %218 = vector.extract_strided_slice %216 {offsets = [0, 128], sizes = [8, 128], strides = [1, 1]} : vector<8x256xf32> to vector<8x128xf32>
    %219 = vector.extract_strided_slice %204 {offsets = [0, 256], sizes = [8, 128], strides = [1, 1]} : vector<8x384xf32> to vector<8x128xf32>
    %220 = vector.extract_strided_slice %206 {offsets = [0, 256], sizes = [8, 128], strides = [1, 1]} : vector<8x384xf32> to vector<8x128xf32>
    %221 = arith.addf %220, %6 : vector<8x128xf32>
    %222 = arith.mulf %217, %221 : vector<8x128xf32>
    %223 = arith.addf %219, %222 : vector<8x128xf32>
    %224 = arith.truncf %223 : vector<8x128xf32> to vector<8x128xbf16>
    %225 = math.tanh %224 : vector<8x128xbf16>
    %226 = arith.extf %225 : vector<8x128xbf16> to vector<8x128xf32>
    %cst_44 = arith.constant 1.000000e+00 : f32
    %227 = vector.broadcast %cst_44 : f32 to vector<8x128xf32>
    %228 = arith.subf %227, %218 : vector<8x128xf32>
    %229 = arith.mulf %228, %226 : vector<8x128xf32>
    %230 = arith.mulf %218, %193 : vector<8x128xf32>
    %231 = arith.addf %229, %230 : vector<8x128xf32>
    %232 = arith.addi %8, %c5_i32 : i32
    %c1_i32_45 = arith.constant 1 : i32
    %233 = arith.addi %232, %c1_i32_45 : i32
    %234 = vector.broadcast %233 : i32 to vector<8x1xi32>
    %235 = arith.cmpi eq, %7, %234 : vector<8x1xi32>
    %236 = vector.shape_cast %235 : vector<8x1xi1> to vector<8x1xi1>
    %237 = vector.broadcast %236 : vector<8x1xi1> to vector<8x128xi1>
    %238 = arith.select %237, %231, %200 : vector<8x128xi1>, vector<8x128xf32>
    %c6_i32 = arith.constant 6 : i32
    %239 = arith.index_cast %c6_i32 : i32 to index
    %c0_46 = arith.constant 0 : index
    %c0_47 = arith.constant 0 : index
    %240 = vector.load %arg2[%239, %c0_46, %c0_47] : memref<8x8x384xbf16, #tpu.memory_space<vmem>>, vector<1x8x384xbf16>
    %241 = vector.shape_cast %240 : vector<1x8x384xbf16> to vector<8x384xbf16>
    %242 = arith.extf %241 : vector<8x384xbf16> to vector<8x384xf32>
    %243 = arith.truncf %231 : vector<8x128xf32> to vector<8x128xbf16>
    %cst_48 = arith.constant dense<0.000000e+00> : vector<8x384xf32>
    %244 = tpu.matmul %243, %3, %cst_48 {dimension_numbers = #tpu.dot_dimension_numbers<[1], [0], [0], [1], [0, 0, 1, 1], [], []>} : vector<8x128xbf16>, vector<128x384xbf16>, vector<8x384xf32> -> vector<8x384xf32>
    %245 = vector.extract_strided_slice %242 {offsets = [0, 0], sizes = [8, 256], strides = [1, 1]} : vector<8x384xf32> to vector<8x256xf32>
    %246 = vector.extract_strided_slice %244 {offsets = [0, 0], sizes = [8, 256], strides = [1, 1]} : vector<8x384xf32> to vector<8x256xf32>
    %247 = arith.addf %245, %246 : vector<8x256xf32>
    %248 = arith.truncf %247 : vector<8x256xf32> to vector<8x256xbf16>
    %249 = arith.negf %248 : vector<8x256xbf16>
    %250 = math.exp %249 : vector<8x256xbf16>
    %cst_49 = arith.constant 1.000000e+00 : bf16
    %251 = vector.broadcast %cst_49 : bf16 to vector<8x256xbf16>
    %252 = arith.addf %251, %250 : vector<8x256xbf16>
    %253 = arith.divf %251, %252 : vector<8x256xbf16>
    %254 = arith.extf %253 : vector<8x256xbf16> to vector<8x256xf32>
    %255 = vector.extract_strided_slice %254 {offsets = [0, 0], sizes = [8, 128], strides = [1, 1]} : vector<8x256xf32> to vector<8x128xf32>
    %256 = vector.extract_strided_slice %254 {offsets = [0, 128], sizes = [8, 128], strides = [1, 1]} : vector<8x256xf32> to vector<8x128xf32>
    %257 = vector.extract_strided_slice %242 {offsets = [0, 256], sizes = [8, 128], strides = [1, 1]} : vector<8x384xf32> to vector<8x128xf32>
    %258 = vector.extract_strided_slice %244 {offsets = [0, 256], sizes = [8, 128], strides = [1, 1]} : vector<8x384xf32> to vector<8x128xf32>
    %259 = arith.addf %258, %6 : vector<8x128xf32>
    %260 = arith.mulf %255, %259 : vector<8x128xf32>
    %261 = arith.addf %257, %260 : vector<8x128xf32>
    %262 = arith.truncf %261 : vector<8x128xf32> to vector<8x128xbf16>
    %263 = math.tanh %262 : vector<8x128xbf16>
    %264 = arith.extf %263 : vector<8x128xbf16> to vector<8x128xf32>
    %cst_50 = arith.constant 1.000000e+00 : f32
    %265 = vector.broadcast %cst_50 : f32 to vector<8x128xf32>
    %266 = arith.subf %265, %256 : vector<8x128xf32>
    %267 = arith.mulf %266, %264 : vector<8x128xf32>
    %268 = arith.mulf %256, %231 : vector<8x128xf32>
    %269 = arith.addf %267, %268 : vector<8x128xf32>
    %270 = arith.addi %8, %c6_i32 : i32
    %c1_i32_51 = arith.constant 1 : i32
    %271 = arith.addi %270, %c1_i32_51 : i32
    %272 = vector.broadcast %271 : i32 to vector<8x1xi32>
    %273 = arith.cmpi eq, %7, %272 : vector<8x1xi32>
    %274 = vector.shape_cast %273 : vector<8x1xi1> to vector<8x1xi1>
    %275 = vector.broadcast %274 : vector<8x1xi1> to vector<8x128xi1>
    %276 = arith.select %275, %269, %238 : vector<8x128xi1>, vector<8x128xf32>
    %c7_i32 = arith.constant 7 : i32
    %277 = arith.index_cast %c7_i32 : i32 to index
    %c0_52 = arith.constant 0 : index
    %c0_53 = arith.constant 0 : index
    %278 = vector.load %arg2[%277, %c0_52, %c0_53] : memref<8x8x384xbf16, #tpu.memory_space<vmem>>, vector<1x8x384xbf16>
    %279 = vector.shape_cast %278 : vector<1x8x384xbf16> to vector<8x384xbf16>
    %280 = arith.extf %279 : vector<8x384xbf16> to vector<8x384xf32>
    %281 = arith.truncf %269 : vector<8x128xf32> to vector<8x128xbf16>
    %cst_54 = arith.constant dense<0.000000e+00> : vector<8x384xf32>
    %282 = tpu.matmul %281, %3, %cst_54 {dimension_numbers = #tpu.dot_dimension_numbers<[1], [0], [0], [1], [0, 0, 1, 1], [], []>} : vector<8x128xbf16>, vector<128x384xbf16>, vector<8x384xf32> -> vector<8x384xf32>
    %283 = vector.extract_strided_slice %280 {offsets = [0, 0], sizes = [8, 256], strides = [1, 1]} : vector<8x384xf32> to vector<8x256xf32>
    %284 = vector.extract_strided_slice %282 {offsets = [0, 0], sizes = [8, 256], strides = [1, 1]} : vector<8x384xf32> to vector<8x256xf32>
    %285 = arith.addf %283, %284 : vector<8x256xf32>
    %286 = arith.truncf %285 : vector<8x256xf32> to vector<8x256xbf16>
    %287 = arith.negf %286 : vector<8x256xbf16>
    %288 = math.exp %287 : vector<8x256xbf16>
    %cst_55 = arith.constant 1.000000e+00 : bf16
    %289 = vector.broadcast %cst_55 : bf16 to vector<8x256xbf16>
    %290 = arith.addf %289, %288 : vector<8x256xbf16>
    %291 = arith.divf %289, %290 : vector<8x256xbf16>
    %292 = arith.extf %291 : vector<8x256xbf16> to vector<8x256xf32>
    %293 = vector.extract_strided_slice %292 {offsets = [0, 0], sizes = [8, 128], strides = [1, 1]} : vector<8x256xf32> to vector<8x128xf32>
    %294 = vector.extract_strided_slice %292 {offsets = [0, 128], sizes = [8, 128], strides = [1, 1]} : vector<8x256xf32> to vector<8x128xf32>
    %295 = vector.extract_strided_slice %280 {offsets = [0, 256], sizes = [8, 128], strides = [1, 1]} : vector<8x384xf32> to vector<8x128xf32>
    %296 = vector.extract_strided_slice %282 {offsets = [0, 256], sizes = [8, 128], strides = [1, 1]} : vector<8x384xf32> to vector<8x128xf32>
    %297 = arith.addf %296, %6 : vector<8x128xf32>
    %298 = arith.mulf %293, %297 : vector<8x128xf32>
    %299 = arith.addf %295, %298 : vector<8x128xf32>
    %300 = arith.truncf %299 : vector<8x128xf32> to vector<8x128xbf16>
    %301 = math.tanh %300 : vector<8x128xbf16>
    %302 = arith.extf %301 : vector<8x128xbf16> to vector<8x128xf32>
    %cst_56 = arith.constant 1.000000e+00 : f32
    %303 = vector.broadcast %cst_56 : f32 to vector<8x128xf32>
    %304 = arith.subf %303, %294 : vector<8x128xf32>
    %305 = arith.mulf %304, %302 : vector<8x128xf32>
    %306 = arith.mulf %294, %269 : vector<8x128xf32>
    %307 = arith.addf %305, %306 : vector<8x128xf32>
    %308 = arith.addi %8, %c7_i32 : i32
    %c1_i32_57 = arith.constant 1 : i32
    %309 = arith.addi %308, %c1_i32_57 : i32
    %310 = vector.broadcast %309 : i32 to vector<8x1xi32>
    %311 = arith.cmpi eq, %7, %310 : vector<8x1xi32>
    %312 = vector.shape_cast %311 : vector<8x1xi1> to vector<8x1xi1>
    %313 = vector.broadcast %312 : vector<8x1xi1> to vector<8x128xi1>
    %314 = arith.select %313, %307, %276 : vector<8x128xi1>, vector<8x128xf32>
    %c8_i32_58 = arith.constant 8 : i32
    %c0_59 = arith.constant 0 : index
    %c0_60 = arith.constant 0 : index
    %315 = vector.load %arg7[%c0_59, %c0_60] : memref<8x128xf32, #tpu.memory_space<vmem>>, vector<8x128xf32>
    tpu.vector_store %arg7[%c0_59, %c0_60], %307 {strides = array<i32>} : memref<8x128xf32, #tpu.memory_space<vmem>>, vector<8x128xf32>,
    %c0_61 = arith.constant 0 : index
    %c0_62 = arith.constant 0 : index
    %316 = vector.load %arg8[%c0_61, %c0_62] : memref<8x128xf32, #tpu.memory_space<vmem>>, vector<8x128xf32>
    tpu.vector_store %arg8[%c0_61, %c0_62], %314 {strides = array<i32>} : memref<8x128xf32, #tpu.memory_space<vmem>>, vector<8x128xf32>,
    %c0_i32_63 = arith.constant 0 : i32
    %317 = arith.cmpi eq, %arg1, %c0_i32_63 : i32
    %318 = arith.extui %317 : i1 to i32
    %c0_i32_64 = arith.constant 0 : i32
    %319 = arith.cmpi ne, %318, %c0_i32_64 : i32
    scf.if %319 {
      %c0_65 = arith.constant 0 : index
      %c0_66 = arith.constant 0 : index
      %320 = vector.load %arg8[%c0_65, %c0_66] : memref<8x128xf32, #tpu.memory_space<vmem>>, vector<8x128xf32>
      %321 = arith.mulf %320, %320 : vector<8x128xf32>
      %cst_67 = arith.constant dense<0.000000e+00> : vector<8xf32>
      %322 = vector.multi_reduction <add>, %321, %cst_67 [1] : vector<8x128xf32> to vector<8xf32>
      %323 = vector.shape_cast %322 : vector<8xf32> to vector<8x1xf32>
      %cst_68 = arith.constant 9.99999996E-13 : f32
      %324 = vector.broadcast %cst_68 : f32 to vector<8x1xf32>
      %325 = arith.addf %323, %324 : vector<8x1xf32>
      %326 = math.rsqrt %325 : vector<8x1xf32>
      %327 = vector.broadcast %326 : vector<8x1xf32> to vector<8x128xf32>
      %328 = arith.mulf %320, %327 : vector<8x128xf32>
      %c0_69 = arith.constant 0 : index
      %c0_70 = arith.constant 0 : index
      %329 = vector.load %arg6[%c0_69, %c0_70] : memref<8x128xf32, #tpu.memory_space<vmem>>, vector<8x128xf32>
      tpu.vector_store %arg6[%c0_69, %c0_70], %328 {strides = array<i32>} : memref<8x128xf32, #tpu.memory_space<vmem>>, vector<8x128xf32>,
    } else {
    }
    return
  }
  func.func @transform_0(%arg0: i32, %arg1: i32) -> (i32, i32, i32) {
    %c0_i32 = arith.constant 0 : i32
    %c0_i32_0 = arith.constant 0 : i32
    return %arg1, %arg0, %c0_i32 : i32, i32, i32
  }
  func.func @transform_1(%arg0: i32, %arg1: i32) -> (i32, i32) {
    %c0_i32 = arith.constant 0 : i32
    %c0_i32_0 = arith.constant 0 : i32
    return %arg0, %c0_i32 : i32, i32
  }
  func.func @transform_2(%arg0: i32, %arg1: i32) -> (i32, i32) {
    %c0_i32 = arith.constant 0 : i32
    %c0_i32_0 = arith.constant 0 : i32
    %c0_i32_1 = arith.constant 0 : i32
    return %c0_i32, %c0_i32_0 : i32, i32
  }
  func.func @transform_3(%arg0: i32, %arg1: i32) -> (i32, i32) {
    %c0_i32 = arith.constant 0 : i32
    %c0_i32_0 = arith.constant 0 : i32
    %c0_i32_1 = arith.constant 0 : i32
    return %c0_i32, %c0_i32_0 : i32, i32
  }
  func.func @transform_4(%arg0: i32, %arg1: i32) -> (i32, i32) {
    %c0_i32 = arith.constant 0 : i32
    %c0_i32_0 = arith.constant 0 : i32
    return %arg0, %c0_i32 : i32, i32
  }
}

</mosaic_0001>

<bundles_post_ra>
// kernel: _lambda_.2
= control target key start
LH: loop header
LB: loop body
LE: loop exit
PB: predicated region body
PF: predicated region fallthrough
CT: control target
= control target key end

     0   :  { %s399_s0 = inlined_call_operand.vmem [shape: f32[8,256], index: 0, kind: input, shape index: {}]   ;;  %s400_s1 = inlined_call_operand.vmem [shape: bf16[256,128], index: 1, kind: input, shape index: {}]   ;;  %s401_s2 = inlined_call_operand.vmem [shape: f32[1,128], index: 2, kind: input, shape index: {}]   ;;  %s402_s3 = inlined_call_operand.hbm [shape: f32[8,128], index: 3, kind: output, shape index: {}]  }
   0x1   :  { %v16_v0 = vld [vmem:[%s399_s0] sm:$0xff]  ;;  %v17_v1 = vld [vmem:[%s399_s0 + $0x8] sm:$0xff]  ;;  %v269_v9 = vld [vmem:[%s400_s1 + $0x50] sm:$0xff]  }
   0x2   :  { %v18_v2 = vmul.f32 %v16_v0, %v16_v0  ;;  %v19_v3 = vmul.f32 %v17_v1, %v17_v1  ;;  %v265_v4 = vld [vmem:[%s400_s1 + $0x40] sm:$0xff]   ;;  %v267_v7 = vld [vmem:[%s400_s1 + $0x48] sm:$0xff]   ;;  %v270_v10 = vld [vmem:[%s400_s1 + $0x10] sm:$0xff]  }
   0x3   :  { %v266_v5 = vld [vmem:[%s400_s1] sm:$0xff]   ;;  %242 = vmatprep.subr.bf16.mxu0 %v265_v4  ;;  %v268_v8 = vld [vmem:[%s400_s1 + $0x8] sm:$0xff]   ;;  %v271_v11 = vld [vmem:[%s400_s1 + $0x58] sm:$0xff]  }
   0x4   :  { %v20_v6 = vadd.f32 %v19_v3, %v18_v2  ;;  %243 = vmatpush3.bf16.msra.mxu0 %v266_v5  ;;  %v272_v12 = vld [vmem:[%s400_s1 + $0x18] sm:$0xff]  }
   0x5   :  { %244 = vmatprep.subr.bf16.mxu0 %v267_v7 }
   0x6   :  { %21 = vadd.xlane.f32.xlu0 %v20_v6 }
   0x8   :  { %245 = vmatpush3.bf16.msra.mxu0 %v268_v8 }
   0x9   :  { %246 = vmatprep.subr.bf16.mxu0 %v269_v9 }
   0xc   :  { %247 = vmatpush3.bf16.msra.mxu0 %v270_v10 }
   0xd   :  { %248 = vmatprep.subr.bf16.mxu0 %v271_v11 }
   0xe   :  { %8 = vsyncpa [#allocation3], 0  ;;  %v273_v13 = vld [vmem:[%s400_s1 + $0x60] sm:$0xff]   ;;  %v275_v15 = vld [vmem:[%s400_s1 + $0x68] sm:$0xff]  }
   0xf   :  { %v274_v14 = vld [vmem:[%s400_s1 + $0x20] sm:$0xff]   ;;  %v276_v16 = vld [vmem:[%s400_s1 + $0x28] sm:$0xff]   ;;  %v277_v17 = vld [vmem:[%s400_s1 + $0x70] sm:$0xff]  }
  0x10   :  { %249 = vmatpush3.bf16.msra.mxu0 %v272_v12  ;;  %v278_v18 = vld [vmem:[%s400_s1 + $0x30] sm:$0xff]   ;;  %v279_v19 = vld [vmem:[%s400_s1 + $0x78] sm:$0xff]   ;;  %v225_v29 = vld [vmem:[%s401_s2] ss:$0 sm:$0xff] }
  0x11   :  { %250 = vmatprep.subr.bf16.mxu0 %v273_v13  ;;  %v280_v20 = vld [vmem:[%s400_s1 + $0x38] sm:$0xff]   ;;  %s309_s1 = smov [#allocation2]  }
  0x12   :  { %s217_s22 = sshll.u32 %s309_s1, 4  ;;  %s218_s22 = int_to_ptr.vmem [resolvable:$true] %s217_s22 }
  0x13   :  { %s285_s23 = scalar_lea.vmem %s218_s22, 128  ;;  %p290_p1 = scmp.lt.s32.totalorder %s218_s22, %s218_s22 }
  0x14   :  { %251 = vmatpush3.bf16.msra.mxu0 %v274_v14  ;;  %p286_p0 = scmp.ne.s32.totalorder %s218_s22, %s285_s23  ;;  %p291_p2 = scmp.lt.s32.totalorder %s285_s23, %s285_s23 }
  0x15   :  { %252 = vmatprep.subr.bf16.mxu0 %v275_v15 }
  0x16   :  { %p292_p3 = por %p291_p2, %p290_p1 }
  0x18   :  { %253 = vmatpush3.bf16.msra.mxu0 %v276_v16  ;;  %p293_p4 = pnand %p292_p3, %p286_p0 }
  0x19   :  { %254 = vmatprep.subr.bf16.mxu0 %v277_v17 }
  0x1c   :  { %255 = vmatpush3.bf16.msra.mxu0 %v278_v18 }
  0x1d   :  { %256 = vmatprep.subr.bf16.mxu0 %v279_v19 }
  0x20   :  { %257 = vmatpush3.bf16.msra.mxu0 %v280_v20 }
  0x93   :  { %v22_v21 = vpop.xlane.xlu0 %21 }
  0x94   :  { %v23_v22 = vadd.f32 1e-12, %v22_v21 }
  0x96   :  { %281 = vrsqrt.f32 %v23_v22 }
  0xa0   :  { %v282_v23 = vpop.eup %281 }
  0xa1   :  { %v26_v24 = vmul.f32 %v282_v23, %v17_v1  ;;  %v25_v25 = vmul.f32 %v282_v23, %v16_v0 }
  0xa3   :  { %v28_v26 = vpack.c.bf16 %v26_v24, %v26_v24  ;;  %v27_v27 = vpack.c.bf16 %v25_v25, %v25_v25 }
  0xa5   :  { %196 = vmatprep.mubr.bf16.mxu0 %v28_v26 }
  0xa6   :  { %197 = vmatmul.mubr.bf16.vlgmr.msra.gmra.mrb[0].mxu0 %v27_v27 }
 0x179   :  { %v258_v28 = vpop.f32.mrb[0].mxu0 }
 0x17a   :  { %v259_v30 = vpop.f32.mrb[1].mxu0 }
 0x17b   :  { %v260_v31 = vadd.f32 %v259_v30, %v258_v28  ;;  %v261_v32 = vpop.f32.mrb[2].mxu0 }
 0x17c   :  { %v262_v33 = vpop.f32.mrb[3].mxu0 }
 0x17d   :  { %v199_v34 = vadd.f32 %v260_v31, %v225_v29 }
 0x17f   :  { %v204_v35 = vmul.f32 %v199_v34, %v199_v34 }
 0x181   :  { %205 = vadd.xlane.f32.xlu0 %v204_v35 }
 0x20e   :  { %v206_v36 = vpop.xlane.xlu0 %205 }
 0x20f   :  { %v207_v37 = vadd.f32 1e-12, %v206_v36 }
 0x211   :  { %283 = vrsqrt.f32 %v207_v37 }
 0x21b   :  { %v284_v38 = vpop.eup %283 }
 0x21c   :  { %v209_v39 = vmul.f32 %v284_v38, %v199_v34 }
 0x21e   :  { %210 = vst [vmem:[#allocation2] sm:$0xff] %v209_v39 }
 0x21f   :  { %296 = shalt.err (!%p293_p4)
}
 0x220   :  { %s297_s24 = scalar_lea.hbm %s402_s3, 128 }
 0x221   :  { %p298_p5 = scmp.ne.s32.totalorder %s402_s3, %s297_s24  ;;  %p301_p6 = scmp.lt.u32.totalorder %s297_s24, %s402_s3 }
 0x223   :  { %p303_p7 = pnand %p301_p6, %p298_p5 }
 0x225   :  { %306 = shalt.err (!%p303_p7)
}
 0x226   :  { %220 = dma.vmem_to_hbm [thread:$0]  %s218_s22, 128, %s402_s3, [#allocation3]  }
 0x227   :  { %307 = dma.done.wait [#allocation3], 128  }
 0x228   :  { %308 = vsyncadd [#allocation3], 4294967168 }
 0x229   :  { %224 = vsyncpa [#allocation3], 1 }

// kernel: _lambda_.3
= control target key start
LH: loop header
LB: loop body
LE: loop exit
PB: predicated region body
PF: predicated region fallthrough
CT: control target
= control target key end

     0   :  { %v1697_v2 = vmov 0   ;;  %v1698_v3 = vmov 0.0   ;;  %vm1699_vm0 = vmmov 0   ;;  %s2329_s0 = inlined_call_operand.vmem [shape: bf16[8,8,384], index: 0, kind: input, shape index: {}]   ;;  %s2330_s1 = inlined_call_operand.vmem [shape: s32[8,1], index: 1, kind: input, shape index: {}]   ;;  %s2331_s2 = inlined_call_operand.vmem [shape: bf16[128,384], index: 2, kind: input, shape index: {}]   ;;  %s2332_s3 = inlined_call_operand.vmem [shape: f32[1,128], index: 3, kind: input, shape index: {}]   ;;  %s2333_s4 = inlined_call_operand.hbm [shape: f32[8,128], index: 4, kind: output, shape index: {}]  }
   0x1   :  { %v1730_v0 = vld [vmem:[%s2331_s2 + $0x4] ss:$12 sps:$4 sm:$0xff]   ;;  %v1735_v1 = vld [vmem:[%s2331_s2] ss:$12 sps:$4 sm:$0xff]   ;;  %235 = vmatprep.mubr.bf16.mxu0 %v1697_v2  ;;  %1366 = vmatprep.subr.bf16.mxu1 %v1698_v3  ;;  %v1743_v4 = vld [vmem:[%s2331_s2 + $0x1c] ss:$12 sps:$4 sm:$0xff]  }
   0x2   :  { %203 = vmatprep.subr.bf16.mxu0 %v1730_v0  ;;  %1382 = vmatprep.mubr.msk.bf16.mxu1 %vm1699_vm0, %v1698_v3  ;;  %v1751_v5 = vld [vmem:[%s2331_s2 + $0x18] ss:$12 sps:$4 sm:$0xff]   ;;  %v1758_v6 = vld [vmem:[%s2331_s2 + $0x34] ss:$12 sps:$4 sm:$0xff]   ;;  %v1765_v7 = vld [vmem:[%s2331_s2 + $0x30] ss:$12 sps:$4 sm:$0xff]  }
   0x3   :  { %204 = vmatpush1.bf16.msra.mxu0 %v1735_v1  ;;  %1531 = vset.pattern.permute.xlu0 %v1697_v2  ;;  %v1771_v8 = vld [vmem:[%s2331_s2 + $0x4c] ss:$12 sps:$4 sm:$0xff]   ;;  %v1776_v9 = vld [vmem:[%s2331_s2 + $0x48] ss:$12 sps:$4 sm:$0xff]   ;;  %v1788_v11 = vld [vmem:[%s2331_s2 + $0x64] ss:$12 sps:$4 sm:$0xff]  }
   0x4   :  { %205 = vmatprep.subr.bf16.mxu0 %v1743_v4  ;;  %1532 = vset.pattern.permute.xlu1 %v1697_v2  ;;  %v1782_v10 = vld [vmem:[%s2331_s2 + $0x8] ss:$12 sps:$4 sm:$0xff]   ;;  %v1794_v12 = vld [vmem:[%s2331_s2 + $0x20] ss:$12 sps:$4 sm:$0xff]   ;;  %v1813_v15 = vld [vmem:[%s2331_s2 + $0x38] ss:$12 sps:$4 sm:$0xff]  }
   0x5   :  { %1367 = vmatpush3.bf16.msra.mxu1 %v1782_v10  ;;  %v1801_v13 = vld [vmem:[%s2331_s2 + $0x60] ss:$12 sps:$4 sm:$0xff]   ;;  %v1807_v14 = vld [vmem:[%s2331_s2 + $0x7c] ss:$12 sps:$4 sm:$0xff]   ;;  %v1825_v17 = vld [vmem:[%s2331_s2 + $0x78] ss:$12 sps:$4 sm:$0xff]  }
   0x6   :  { %1368 = vmatprep.subr.bf16.mxu1 %v1698_v3  ;;  %v1819_v16 = vld [vmem:[%s2330_s1] sm:$0xff] }
   0x7   :  { %206 = vmatpush1.bf16.msra.mxu0 %v1751_v5  ;;  %vm316_vm1 = vcmp.eq.s32.totalorder %v1819_v16, 1 }
   0x8   :  { %207 = vmatprep.subr.bf16.mxu0 %v1758_v6 }
   0x9   :  { %1369 = vmatpush3.bf16.msra.mxu1 %v1794_v12 }
   0xa   :  { %1370 = vmatprep.subr.bf16.mxu1 %v1698_v3 }
   0xb   :  { %208 = vmatpush1.bf16.msra.mxu0 %v1765_v7 }
   0xc   :  { %209 = vmatprep.subr.bf16.mxu0 %v1771_v8 }
   0xf   :  { %210 = vmatpush1.bf16.msra.mxu0 %v1776_v9 }
  0x10   :  { %211 = vmatprep.subr.bf16.mxu0 %v1788_v11 }
  0x13   :  { %212 = vmatpush1.bf16.msra.mxu0 %v1801_v13 }
  0x14   :  { %9 = vsyncpa [#allocation5], 0  ;;  %213 = vmatprep.subr.bf16.mxu0 %v1807_v14  ;;  %v1832_v18 = vld [vmem:[%s2331_s2 + $0x94] ss:$12 sps:$4 sm:$0xff]   ;;  %v317_v19 = vsel %vm316_vm1, 1, %v1697_v2  ;;  %1371 = vmatpush3.bf16.msra.mxu1 %v1813_v15  ;;  %v1700_v27 = vmov 0.0|0.0  }
  0x15   :  { %v1839_v20 = vld [vmem:[%s2331_s2 + $0x50] ss:$12 sps:$4 sm:$0xff]   ;;  %319 = vperm.xlu0 %1531, %v317_v19   ;;  %1372 = vmatprep.subr.bf16.mxu1 %v1698_v3  ;;  %v1852_v22 = vld [vmem:[%s2331_s2 + $0xac] ss:$12 sps:$4 sm:$0xff]   ;;  %v1858_v23 = vld [vmem:[%s2331_s2 + $0x68] ss:$12 sps:$4 sm:$0xff]  }
  0x16   :  { %v1846_v21 = vld [vmem:[%s2331_s2 + $0x90] ss:$12 sps:$4 sm:$0xff]   ;;  %v1865_v24 = vld [vmem:[%s2331_s2 + $0xa8] ss:$12 sps:$4 sm:$0xff]   ;;  %v1872_v25 = vld [vmem:[%s2331_s2 + $0x80] ss:$12 sps:$4 sm:$0xff]  }
  0x17   :  { %214 = vmatpush1.bf16.msra.mxu0 %v1825_v17  ;;  %v1881_v26 = vld [vmem:[%s2331_s2 + $0x98] ss:$12 sps:$4 sm:$0xff]   ;;  %v1891_v28 = vld [vmem:[%s2331_s2 + $0xb0] ss:$12 sps:$4 sm:$0xff]   ;;  %vm443_vm2 = vcmp.eq.s32.totalorder %v1819_v16, 2  ;;  %vm570_vm3 = vcmp.eq.s32.totalorder %v1819_v16, 3 }
  0x18   :  { %215 = vmatprep.subr.bf16.mxu0 %v1832_v18  ;;  %1373 = vmatpush3.bf16.msra.mxu1 %v1839_v20  ;;  %v444_v29 = vsel %vm443_vm2, 1, %v1697_v2  ;;  %v69_v30 = vld [vmem:[%s2329_s0] sm:$0xff]  ;;  %v1941_v53 = vld [vmem:[%s2329_s0 + $0x8] ss:$12 sps:$4 sm:$0xff]   ;;  %vm697_vm4 = vcmp.eq.s32.totalorder %v1819_v16, 4  ;;  %vm824_vm5 = vcmp.eq.s32.totalorder %v1819_v16, 5 }
  0x19   :  { %1374 = vmatprep.subr.bf16.mxu1 %v1698_v3  ;;  %446 = vperm.xlu0 %1531, %v444_v29   ;;  %v71_v31 = vunpack.c.l.bf16 %v69_v30  ;;  %v72_v32 = vunpack.c.h.bf16 %v69_v30  ;;  %v1936_v51 = vld [vmem:[%s2332_s3] ss:$0 sm:$0xff]  ;;  %v73_v56 = vunpack.c.l.bf16 %v1941_v53  ;;  %vm951_vm6 = vcmp.eq.s32.totalorder %v1819_v16, 6 }
  0x1a   :  { %vm1078_vm7 = vcmp.eq.s32.totalorder %v1819_v16, 7 }
  0x1b   :  { %216 = vmatpush1.bf16.msra.mxu0 %v1846_v21 }
  0x1c   :  { %217 = vmatprep.subr.bf16.mxu0 %v1852_v22  ;;  %1375 = vmatpush3.bf16.msra.mxu1 %v1858_v23 }
  0x1d   :  { %1376 = vmatprep.subr.bf16.mxu1 %v1698_v3 }
  0x1f   :  { %218 = vmatpush1.bf16.msra.mxu0 %v1865_v24 }
  0x20   :  { %330 = vmatprep.subr.bf16.mxu0 %v1730_v0  ;;  %1377 = vmatpush3.bf16.msra.mxu1 %v1872_v25 }
  0x21   :  { %1378 = vmatprep.subr.bf16.mxu1 %v1698_v3 }
  0x22   :  { %236 = vmatmul.mubr.bf16.vlgmr.msra.gmra.mrb[0].mxu0 %v1700_v27 }
  0x23   :  { %331 = vmatpush1.bf16.msra.mxu0 %v1735_v1  ;;  %362 = vmatprep.mubr.bf16.mxu0 %v1697_v2 }
  0x24   :  { %332 = vmatprep.subr.bf16.mxu0 %v1743_v4  ;;  %1379 = vmatpush3.bf16.msra.mxu1 %v1881_v26 }
  0x25   :  { %1380 = vmatprep.subr.bf16.mxu1 %v1698_v3 }
  0x27   :  { %333 = vmatpush1.bf16.msra.mxu0 %v1751_v5 }
  0x28   :  { %334 = vmatprep.subr.bf16.mxu0 %v1758_v6  ;;  %1381 = vmatpush3.bf16.msra.mxu1 %v1891_v28 }
  0x29   :  { %1386 = vmatprep.subr.bf16.mxu1 %v1698_v3 }
  0x2b   :  { %335 = vmatpush1.bf16.msra.mxu0 %v1765_v7  ;;  %1383 = vmatmul.mubr.bf16.vlgmr.msra.gmra.mrb[0].mxu1 %v1700_v27 }
  0x2c   :  { %336 = vmatprep.subr.bf16.mxu0 %v1771_v8  ;;  %1387 = vmatpush3.bf16.msra.mxu1 %v1782_v10 }
  0x2d   :  { %1402 = vmatprep.mubr.msk.bf16.mxu1 %vm1699_vm0, %v1698_v3  ;;  %1388 = vmatprep.subr.bf16.mxu1 %v1698_v3 }
  0x2f   :  { %337 = vmatpush1.bf16.msra.mxu0 %v1776_v9 }
  0x30   :  { %338 = vmatprep.subr.bf16.mxu0 %v1788_v11  ;;  %1389 = vmatpush3.bf16.msra.mxu1 %v1794_v12 }
  0x31   :  { %1390 = vmatprep.subr.bf16.mxu1 %v1698_v3 }
  0x33   :  { %339 = vmatpush1.bf16.msra.mxu0 %v1801_v13 }
  0x34   :  { %340 = vmatprep.subr.bf16.mxu0 %v1807_v14  ;;  %1391 = vmatpush3.bf16.msra.mxu1 %v1813_v15 }
  0x35   :  { %1392 = vmatprep.subr.bf16.mxu1 %v1698_v3 }
  0x37   :  { %341 = vmatpush1.bf16.msra.mxu0 %v1825_v17 }
  0x38   :  { %342 = vmatprep.subr.bf16.mxu0 %v1832_v18  ;;  %1393 = vmatpush3.bf16.msra.mxu1 %v1839_v20 }
  0x39   :  { %1394 = vmatprep.subr.bf16.mxu1 %v1698_v3 }
  0x3b   :  { %343 = vmatpush1.bf16.msra.mxu0 %v1846_v21 }
  0x3c   :  { %344 = vmatprep.subr.bf16.mxu0 %v1852_v22  ;;  %1395 = vmatpush3.bf16.msra.mxu1 %v1858_v23 }
  0x3d   :  { %1396 = vmatprep.subr.bf16.mxu1 %v1698_v3 }
  0x3f   :  { %345 = vmatpush1.bf16.msra.mxu0 %v1865_v24 }
  0x40   :  { %457 = vmatprep.subr.bf16.mxu0 %v1730_v0  ;;  %1397 = vmatpush3.bf16.msra.mxu1 %v1872_v25 }
  0x41   :  { %1398 = vmatprep.subr.bf16.mxu1 %v1698_v3 }
  0x44   :  { %1399 = vmatpush3.bf16.msra.mxu1 %v1881_v26 }
  0x45   :  { %1400 = vmatprep.subr.bf16.mxu1 %v1698_v3 }
  0x48   :  { %1401 = vmatpush3.bf16.msra.mxu1 %v1891_v28 }
  0x49   :  { %1406 = vmatprep.subr.bf16.mxu1 %v1698_v3 }
  0xf5   :  { %v237_v33 = vpop.f32.mrb[0].mxu0 }
  0xf6   :  { %v284_v34 = vadd.f32 %v237_v33, %v71_v31  ;;  %v239_v35 = vpop.f32.mrb[1].mxu0 }
  0xf7   :  { %v241_v36 = vpop.f32.mrb[2].mxu0  ;;  %v285_v38 = vadd.f32 %v239_v35, %v72_v32  ;;  %v1266_v35 = vld [vmem:[%s2329_s0 + $0xc] sm:$0xff] }
  0xf8   :  { %v286_v37 = vpack.c.bf16 %v284_v34, %v284_v34  ;;  %v242_v39 = vpop.f32.mrb[3].mxu0  ;;  %v571_v34 = vsel %vm570_vm3, 1, %v1697_v2  ;;  %v326_v36 = vunpack.c.l.bf16 %v1266_v35 }
  0xf9   :  { %v287_v41 = vpack.c.bf16 %v285_v38, %v285_v38  ;;  %573 = vperm.xlu1 %1532, %v571_v34  }
  0xfa   :  { %v1264_v40 = vmul.bf16 3216621497, %v286_v37  ;;  %v327_v37 = vunpack.c.h.bf16 %v1266_v35 }
  0xfb   :  { %v1265_v43 = vmul.bf16 3216621497, %v287_v41 }
  0xfc   :  { %1565 = vpow.bf16 %v1264_v40 }
  0xfd   :  { %1567 = vpow.bf16 %v1265_v43 }
  0xfe   :  { %v278_v42 = vpop.f32.mrb[0].mxu1 }
  0xff   :  { %v1384_v44 = vpop.f32.mrb[1].mxu1  ;;  %v304_v55 = vadd.f32 %v1936_v51, %v278_v42 }
 0x100   :  { %v281_v45 = vpop.f32.mrb[2].mxu1 }
 0x101   :  { %v1385_v46 = vpop.f32.mrb[3].mxu1 }
 0x107   :  { %v1566_v47 = vpop.eup %1565 }
 0x108   :  { %v296_v48 = vadd.bf16 1065369472, %v1566_v47  ;;  %v1568_v49 = vpop.eup %1567 }
 0x109   :  { %v297_v50 = vadd.bf16 1065369472, %v1568_v49 }
 0x10a   :  { %1569 = vrcp.bf16 %v296_v48 }
 0x10b   :  { %1571 = vrcp.bf16 %v297_v50 }
 0x115   :  { %v1570_v52 = vpop.eup %1569 }
 0x116   :  { %v299_v54 = vmul.bf16 1065369472, %v1570_v52  ;;  %v1572_v61 = vpop.eup %1571 }
 0x117   :  { %v301_v62 = vmul.bf16 1065369472, %v1572_v61 }
 0x118   :  { %v302_v57 = vunpack.c.l.bf16 %v299_v54 }
 0x119   :  { %v303_v63 = vunpack.c.l.bf16 %v301_v62 }
 0x11a   :  { %v305_v58 = vmul.f32 %v304_v55, %v302_v57 }
 0x11b   :  { %v310_v29 = vsub.f32 1.0, %v303_v63  ;;  %v312_v31 = vmul.f32 0.0, %v303_v63 }
 0x11c   :  { %v306_v59 = vadd.f32 %v305_v58, %v73_v56 }
 0x11e   :  { %v307_v60 = vpack.c.bf16 %v306_v59, %v306_v59 }
 0x120   :  { %1573 = vtanh.bf16 %v307_v60  ;;  %v328_v60 = vunpack.c.h.bf16 %v1941_v53 }
 0x12b   :  { %v1574_v19 = vpop.eup %1573 }
 0x12c   :  { %v309_v27 = vunpack.c.l.bf16 %v1574_v19 }
 0x12e   :  { %v311_v30 = vmul.f32 %v310_v29, %v309_v27 }
 0x130   :  { %v1945_v32 = vadd.f32 %v312_v31, %v311_v30 }
 0x132   :  { %v329_v33 = vpack.c.bf16 %v1945_v32, %v1945_v32 }
 0x134   :  { %363 = vmatmul.mubr.bf16.vlgmr.msra.gmra.mrb[4].mxu0 %v329_v33  ;;  %1403 = vmatmul.mubr.bf16.vlgmr.msra.gmra.mrb[4].mxu1 %v329_v33 }
 0x135   :  { %458 = vmatpush1.bf16.msra.mxu0 %v1735_v1  ;;  %1407 = vmatpush3.bf16.msra.mxu1 %v1782_v10 }
 0x136   :  { %459 = vmatprep.subr.bf16.mxu0 %v1743_v4  ;;  %1408 = vmatprep.subr.bf16.mxu1 %v1698_v3 }
 0x137   :  { %489 = vmatprep.mubr.bf16.mxu0 %v1697_v2  ;;  %1422 = vmatprep.mubr.msk.bf16.mxu1 %vm1699_vm0, %v1698_v3 }
 0x139   :  { %460 = vmatpush1.bf16.msra.mxu0 %v1751_v5  ;;  %1409 = vmatpush3.bf16.msra.mxu1 %v1794_v12 }
 0x13a   :  { %461 = vmatprep.subr.bf16.mxu0 %v1758_v6  ;;  %1410 = vmatprep.subr.bf16.mxu1 %v1698_v3 }
 0x13d   :  { %462 = vmatpush1.bf16.msra.mxu0 %v1765_v7  ;;  %1411 = vmatpush3.bf16.msra.mxu1 %v1813_v15 }
 0x13e   :  { %463 = vmatprep.subr.bf16.mxu0 %v1771_v8  ;;  %1412 = vmatprep.subr.bf16.mxu1 %v1698_v3 }
 0x141   :  { %464 = vmatpush1.bf16.msra.mxu0 %v1776_v9  ;;  %1413 = vmatpush3.bf16.msra.mxu1 %v1839_v20 }
 0x142   :  { %465 = vmatprep.subr.bf16.mxu0 %v1788_v11  ;;  %1414 = vmatprep.subr.bf16.mxu1 %v1698_v3 }
 0x145   :  { %466 = vmatpush1.bf16.msra.mxu0 %v1801_v13  ;;  %1415 = vmatpush3.bf16.msra.mxu1 %v1858_v23 }
 0x146   :  { %467 = vmatprep.subr.bf16.mxu0 %v1807_v14  ;;  %1416 = vmatprep.subr.bf16.mxu1 %v1698_v3 }
 0x149   :  { %468 = vmatpush1.bf16.msra.mxu0 %v1825_v17  ;;  %1417 = vmatpush3.bf16.msra.mxu1 %v1872_v25 }
 0x14a   :  { %469 = vmatprep.subr.bf16.mxu0 %v1832_v18  ;;  %1418 = vmatprep.subr.bf16.mxu1 %v1698_v3 }
 0x14d   :  { %470 = vmatpush1.bf16.msra.mxu0 %v1846_v21  ;;  %1419 = vmatpush3.bf16.msra.mxu1 %v1881_v26 }
 0x14e   :  { %471 = vmatprep.subr.bf16.mxu0 %v1852_v22  ;;  %1420 = vmatprep.subr.bf16.mxu1 %v1698_v3 }
 0x151   :  { %472 = vmatpush1.bf16.msra.mxu0 %v1865_v24  ;;  %1421 = vmatpush3.bf16.msra.mxu1 %v1891_v28 }
 0x152   :  { %584 = vmatprep.subr.bf16.mxu0 %v1730_v0  ;;  %1426 = vmatprep.subr.bf16.mxu1 %v1698_v3 }
 0x207   :  { %v364_v38 = vpop.f32.mrb[4].mxu0  ;;  %v405_v39 = vpop.f32.mrb[4].mxu1 }
 0x208   :  { %v411_v40 = vadd.f32 %v364_v38, %v326_v36  ;;  %v366_v41 = vpop.f32.mrb[5].mxu0  ;;  %v1404_v42 = vpop.f32.mrb[5].mxu1  ;;  %v431_v62 = vadd.f32 %v1936_v51, %v405_v39  ;;  %v698_v39 = vsel %vm697_vm4, 1, %v1697_v2 }
 0x209   :  { %v368_v43 = vpop.f32.mrb[6].mxu0  ;;  %v408_v44 = vpop.f32.mrb[6].mxu1  ;;  %v412_v46 = vadd.f32 %v366_v41, %v327_v37  ;;  %700 = vperm.xlu1 %1532, %v698_v39  }
 0x20a   :  { %v413_v45 = vpack.c.bf16 %v411_v40, %v411_v40  ;;  %v369_v47 = vpop.f32.mrb[7].mxu0  ;;  %v1405_v48 = vpop.f32.mrb[7].mxu1  ;;  %v1270_v40 = vld [vmem:[%s2329_s0 + $0x18] sm:$0xff] }
 0x20b   :  { %v414_v50 = vpack.c.bf16 %v412_v46, %v412_v46  ;;  %v453_v41 = vunpack.c.l.bf16 %v1270_v40  ;;  %v454_v42 = vunpack.c.h.bf16 %v1270_v40 }
 0x20c   :  { %v1268_v49 = vmul.bf16 3216621497, %v413_v45 }
 0x20d   :  { %v1269_v52 = vmul.bf16 3216621497, %v414_v50 }
 0x20e   :  { %1575 = vpow.bf16 %v1268_v49 }
 0x20f   :  { %1577 = vpow.bf16 %v1269_v52 }
 0x219   :  { %v1576_v54 = vpop.eup %1575 }
 0x21a   :  { %v423_v55 = vadd.bf16 1065369472, %v1576_v54  ;;  %v1578_v56 = vpop.eup %1577 }
 0x21b   :  { %v424_v57 = vadd.bf16 1065369472, %v1578_v56 }
 0x21c   :  { %1579 = vrcp.bf16 %v423_v55 }
 0x21d   :  { %1581 = vrcp.bf16 %v424_v57 }
 0x227   :  { %v1580_v58 = vpop.eup %1579 }
 0x228   :  { %v426_v59 = vmul.bf16 1065369472, %v1580_v58  ;;  %v1582_v29 = vpop.eup %1581 }
 0x229   :  { %v428_v30 = vmul.bf16 1065369472, %v1582_v29 }
 0x22a   :  { %v429_v61 = vunpack.c.l.bf16 %v426_v59 }
 0x22b   :  { %v430_v31 = vunpack.c.l.bf16 %v428_v30 }
 0x22c   :  { %v432_v63 = vmul.f32 %v431_v62, %v429_v61 }
 0x22d   :  { %v437_v35 = vsub.f32 1.0, %v430_v31  ;;  %v439_v37 = vmul.f32 %v430_v31, %v1945_v32 }
 0x22e   :  { %v433_v19 = vadd.f32 %v432_v63, %v328_v60 }
 0x230   :  { %v434_v27 = vpack.c.bf16 %v433_v19, %v433_v19  ;;  %v2039_v19 = vld [vmem:[%s2329_s0 + $0x20] ss:$12 sps:$4 sm:$0xff]  }
 0x231   :  { %v455_v29 = vunpack.c.l.bf16 %v2039_v19 }
 0x232   :  { %1583 = vtanh.bf16 %v434_v27 }
 0x23d   :  { %v1584_v33 = vpop.eup %1583 }
 0x23e   :  { %v436_v34 = vunpack.c.l.bf16 %v1584_v33 }
 0x240   :  { %v438_v36 = vmul.f32 %v437_v35, %v436_v34 }
 0x242   :  { %v1992_v38 = vadd.f32 %v439_v37, %v438_v36 }
 0x244   :  { %v456_v53 = vpack.c.bf16 %v1992_v38, %v1992_v38 }
 0x246   :  { %490 = vmatmul.mubr.bf16.vlgmr.msra.gmra.mrb[8].mxu0 %v456_v53  ;;  %1423 = vmatmul.mubr.bf16.vlgmr.msra.gmra.mrb[8].mxu1 %v456_v53 }
 0x247   :  { %585 = vmatpush1.bf16.msra.mxu0 %v1735_v1  ;;  %1427 = vmatpush3.bf16.msra.mxu1 %v1782_v10 }
 0x248   :  { %586 = vmatprep.subr.bf16.mxu0 %v1743_v4  ;;  %1428 = vmatprep.subr.bf16.mxu1 %v1698_v3 }
 0x249   :  { %616 = vmatprep.mubr.bf16.mxu0 %v1697_v2  ;;  %1442 = vmatprep.mubr.msk.bf16.mxu1 %vm1699_vm0, %v1698_v3 }
 0x24b   :  { %587 = vmatpush1.bf16.msra.mxu0 %v1751_v5  ;;  %1429 = vmatpush3.bf16.msra.mxu1 %v1794_v12 }
 0x24c   :  { %588 = vmatprep.subr.bf16.mxu0 %v1758_v6  ;;  %1430 = vmatprep.subr.bf16.mxu1 %v1698_v3 }
 0x24f   :  { %589 = vmatpush1.bf16.msra.mxu0 %v1765_v7  ;;  %1431 = vmatpush3.bf16.msra.mxu1 %v1813_v15 }
 0x250   :  { %590 = vmatprep.subr.bf16.mxu0 %v1771_v8  ;;  %1432 = vmatprep.subr.bf16.mxu1 %v1698_v3 }
 0x253   :  { %591 = vmatpush1.bf16.msra.mxu0 %v1776_v9  ;;  %1433 = vmatpush3.bf16.msra.mxu1 %v1839_v20 }
 0x254   :  { %592 = vmatprep.subr.bf16.mxu0 %v1788_v11  ;;  %1434 = vmatprep.subr.bf16.mxu1 %v1698_v3 }
 0x257   :  { %593 = vmatpush1.bf16.msra.mxu0 %v1801_v13  ;;  %1435 = vmatpush3.bf16.msra.mxu1 %v1858_v23 }
 0x258   :  { %594 = vmatprep.subr.bf16.mxu0 %v1807_v14  ;;  %1436 = vmatprep.subr.bf16.mxu1 %v1698_v3 }
 0x25b   :  { %595 = vmatpush1.bf16.msra.mxu0 %v1825_v17  ;;  %1437 = vmatpush3.bf16.msra.mxu1 %v1872_v25 }
 0x25c   :  { %596 = vmatprep.subr.bf16.mxu0 %v1832_v18  ;;  %1438 = vmatprep.subr.bf16.mxu1 %v1698_v3 }
 0x25f   :  { %597 = vmatpush1.bf16.msra.mxu0 %v1846_v21  ;;  %1439 = vmatpush3.bf16.msra.mxu1 %v1881_v26 }
 0x260   :  { %598 = vmatprep.subr.bf16.mxu0 %v1852_v22  ;;  %1440 = vmatprep.subr.bf16.mxu1 %v1698_v3 }
 0x263   :  { %599 = vmatpush1.bf16.msra.mxu0 %v1865_v24  ;;  %1441 = vmatpush3.bf16.msra.mxu1 %v1891_v28 }
 0x264   :  { %711 = vmatprep.subr.bf16.mxu0 %v1730_v0  ;;  %1446 = vmatprep.subr.bf16.mxu1 %v1698_v3 }
 0x319   :  { %v491_v43 = vpop.f32.mrb[8].mxu0  ;;  %v532_v44 = vpop.f32.mrb[8].mxu1 }
 0x31a   :  { %v538_v45 = vadd.f32 %v491_v43, %v453_v41  ;;  %v493_v46 = vpop.f32.mrb[9].mxu0  ;;  %v1424_v47 = vpop.f32.mrb[9].mxu1  ;;  %v558_v31 = vadd.f32 %v1936_v51, %v532_v44  ;;  %v825_v44 = vsel %vm824_vm5, 1, %v1697_v2 }
 0x31b   :  { %v495_v48 = vpop.f32.mrb[10].mxu0  ;;  %v535_v49 = vpop.f32.mrb[10].mxu1  ;;  %v539_v52 = vadd.f32 %v493_v46, %v454_v42  ;;  %827 = vperm.xlu0 %1531, %v825_v44   ;;  %v1274_v47 = vld [vmem:[%s2329_s0 + $0x24] sm:$0xff] }
 0x31c   :  { %v540_v50 = vpack.c.bf16 %v538_v45, %v538_v45  ;;  %v496_v54 = vpop.f32.mrb[11].mxu0  ;;  %v1425_v55 = vpop.f32.mrb[11].mxu1  ;;  %v580_v48 = vunpack.c.l.bf16 %v1274_v47  ;;  %v581_v49 = vunpack.c.h.bf16 %v1274_v47 }
 0x31d   :  { %v541_v57 = vpack.c.bf16 %v539_v52, %v539_v52 }
 0x31e   :  { %v1272_v56 = vmul.bf16 3216621497, %v540_v50 }
 0x31f   :  { %v1273_v58 = vmul.bf16 3216621497, %v541_v57 }
 0x320   :  { %1585 = vpow.bf16 %v1272_v56 }
 0x321   :  { %1587 = vpow.bf16 %v1273_v58 }
 0x32b   :  { %v1586_v59 = vpop.eup %1585 }
 0x32c   :  { %v550_v60 = vadd.bf16 1065369472, %v1586_v59  ;;  %v1588_v61 = vpop.eup %1587 }
 0x32d   :  { %v551_v62 = vadd.bf16 1065369472, %v1588_v61 }
 0x32e   :  { %1589 = vrcp.bf16 %v550_v60 }
 0x32f   :  { %1591 = vrcp.bf16 %v551_v62 }
 0x339   :  { %v1590_v63 = vpop.eup %1589 }
 0x33a   :  { %v553_v27 = vmul.bf16 1065369472, %v1590_v63  ;;  %v1592_v36 = vpop.eup %1591 }
 0x33b   :  { %v555_v37 = vmul.bf16 1065369472, %v1592_v36 }
 0x33c   :  { %v556_v30 = vunpack.c.l.bf16 %v553_v27 }
 0x33d   :  { %v557_v53 = vunpack.c.l.bf16 %v555_v37  ;;  %v582_v37 = vunpack.c.h.bf16 %v2039_v19 }
 0x33e   :  { %v559_v33 = vmul.f32 %v558_v31, %v556_v30 }
 0x33f   :  { %v564_v41 = vsub.f32 1.0, %v557_v53  ;;  %v566_v43 = vmul.f32 %v557_v53, %v1992_v38 }
 0x340   :  { %v560_v34 = vadd.f32 %v559_v33, %v455_v29 }
 0x342   :  { %v561_v35 = vpack.c.bf16 %v560_v34, %v560_v34 }
 0x344   :  { %1593 = vtanh.bf16 %v561_v35 }
 0x34f   :  { %v1594_v39 = vpop.eup %1593 }
 0x350   :  { %v563_v40 = vunpack.c.l.bf16 %v1594_v39 }
 0x352   :  { %v565_v42 = vmul.f32 %v564_v41, %v563_v40 }
 0x354   :  { %v2044_v45 = vadd.f32 %v566_v43, %v565_v42 }
 0x356   :  { %v583_v46 = vpack.c.bf16 %v2044_v45, %v2044_v45 }
 0x358   :  { %617 = vmatmul.mubr.bf16.vlgmr.msra.gmra.mrb[12].mxu0 %v583_v46  ;;  %1443 = vmatmul.mubr.bf16.vlgmr.msra.gmra.mrb[12].mxu1 %v583_v46 }
 0x359   :  { %712 = vmatpush1.bf16.msra.mxu0 %v1735_v1  ;;  %1447 = vmatpush3.bf16.msra.mxu1 %v1782_v10 }
 0x35a   :  { %713 = vmatprep.subr.bf16.mxu0 %v1743_v4  ;;  %1448 = vmatprep.subr.bf16.mxu1 %v1698_v3 }
 0x35b   :  { %743 = vmatprep.mubr.bf16.mxu0 %v1697_v2  ;;  %1462 = vmatprep.mubr.msk.bf16.mxu1 %vm1699_vm0, %v1698_v3 }
 0x35d   :  { %714 = vmatpush1.bf16.msra.mxu0 %v1751_v5  ;;  %1449 = vmatpush3.bf16.msra.mxu1 %v1794_v12 }
 0x35e   :  { %715 = vmatprep.subr.bf16.mxu0 %v1758_v6  ;;  %1450 = vmatprep.subr.bf16.mxu1 %v1698_v3 }
 0x361   :  { %716 = vmatpush1.bf16.msra.mxu0 %v1765_v7  ;;  %1451 = vmatpush3.bf16.msra.mxu1 %v1813_v15 }
 0x362   :  { %717 = vmatprep.subr.bf16.mxu0 %v1771_v8  ;;  %1452 = vmatprep.subr.bf16.mxu1 %v1698_v3 }
 0x365   :  { %718 = vmatpush1.bf16.msra.mxu0 %v1776_v9  ;;  %1453 = vmatpush3.bf16.msra.mxu1 %v1839_v20 }
 0x366   :  { %719 = vmatprep.subr.bf16.mxu0 %v1788_v11  ;;  %1454 = vmatprep.subr.bf16.mxu1 %v1698_v3 }
 0x369   :  { %720 = vmatpush1.bf16.msra.mxu0 %v1801_v13  ;;  %1455 = vmatpush3.bf16.msra.mxu1 %v1858_v23 }
 0x36a   :  { %721 = vmatprep.subr.bf16.mxu0 %v1807_v14  ;;  %1456 = vmatprep.subr.bf16.mxu1 %v1698_v3 }
 0x36d   :  { %722 = vmatpush1.bf16.msra.mxu0 %v1825_v17  ;;  %1457 = vmatpush3.bf16.msra.mxu1 %v1872_v25 }
 0x36e   :  { %723 = vmatprep.subr.bf16.mxu0 %v1832_v18  ;;  %1458 = vmatprep.subr.bf16.mxu1 %v1698_v3 }
 0x371   :  { %724 = vmatpush1.bf16.msra.mxu0 %v1846_v21  ;;  %1459 = vmatpush3.bf16.msra.mxu1 %v1881_v26 }
 0x372   :  { %725 = vmatprep.subr.bf16.mxu0 %v1852_v22  ;;  %1460 = vmatprep.subr.bf16.mxu1 %v1698_v3 }
 0x375   :  { %726 = vmatpush1.bf16.msra.mxu0 %v1865_v24  ;;  %1461 = vmatpush3.bf16.msra.mxu1 %v1891_v28 }
 0x376   :  { %838 = vmatprep.subr.bf16.mxu0 %v1730_v0  ;;  %1466 = vmatprep.subr.bf16.mxu1 %v1698_v3 }
 0x42b   :  { %v618_v50 = vpop.f32.mrb[12].mxu0  ;;  %v659_v52 = vpop.f32.mrb[12].mxu1 }
 0x42c   :  { %v665_v54 = vadd.f32 %v618_v50, %v580_v48  ;;  %v620_v55 = vpop.f32.mrb[13].mxu0  ;;  %v1444_v56 = vpop.f32.mrb[13].mxu1  ;;  %v685_v39 = vadd.f32 %v1936_v51, %v659_v52 }
 0x42d   :  { %v622_v57 = vpop.f32.mrb[14].mxu0  ;;  %v662_v58 = vpop.f32.mrb[14].mxu1  ;;  %v666_v60 = vadd.f32 %v620_v55, %v581_v49 }
 0x42e   :  { %v667_v59 = vpack.c.bf16 %v665_v54, %v665_v54  ;;  %v623_v61 = vpop.f32.mrb[15].mxu0  ;;  %v1445_v62 = vpop.f32.mrb[15].mxu1 }
 0x42f   :  { %v668_v27 = vpack.c.bf16 %v666_v60, %v666_v60 }
 0x430   :  { %v1276_v63 = vmul.bf16 3216621497, %v667_v59 }
 0x431   :  { %v1277_v29 = vmul.bf16 3216621497, %v668_v27 }
 0x432   :  { %1595 = vpow.bf16 %v1276_v63 }
 0x433   :  { %1597 = vpow.bf16 %v1277_v29 }
 0x43d   :  { %v1596_v30 = vpop.eup %1595 }
 0x43e   :  { %v677_v31 = vadd.bf16 1065369472, %v1596_v30  ;;  %v1598_v33 = vpop.eup %1597 }
 0x43f   :  { %v678_v34 = vadd.bf16 1065369472, %v1598_v33 }
 0x440   :  { %1599 = vrcp.bf16 %v677_v31 }
 0x441   :  { %1601 = vrcp.bf16 %v678_v34 }
 0x44b   :  { %v1600_v35 = vpop.eup %1599 }
 0x44c   :  { %v680_v36 = vmul.bf16 1065369472, %v1600_v35  ;;  %v1602_v43 = vpop.eup %1601 }
 0x44d   :  { %v682_v46 = vmul.bf16 1065369472, %v1602_v43 }
 0x44e   :  { %v683_v53 = vunpack.c.l.bf16 %v680_v36 }
 0x44f   :  { %v684_v44 = vunpack.c.l.bf16 %v682_v46 }
 0x450   :  { %v686_v40 = vmul.f32 %v685_v39, %v683_v53  ;;  %v2138_v53 = vld [vmem:[%s2329_s0 + $0x38] ss:$12 sps:$4 sm:$0xff]  }
 0x451   :  { %v691_v49 = vsub.f32 1.0, %v684_v44  ;;  %v693_v54 = vmul.f32 %v684_v44, %v2044_v45 }
 0x452   :  { %v687_v41 = vadd.f32 %v686_v40, %v582_v37  ;;  %v709_v40 = vunpack.c.l.bf16 %v2138_v53 }
 0x454   :  { %v688_v42 = vpack.c.bf16 %v687_v41, %v687_v41 }
 0x456   :  { %1603 = vtanh.bf16 %v688_v42 }
 0x461   :  { %v1604_v47 = vpop.eup %1603 }
 0x462   :  { %v690_v48 = vunpack.c.l.bf16 %v1604_v47 }
 0x464   :  { %v692_v50 = vmul.f32 %v691_v49, %v690_v48 }
 0x466   :  { %v2091_v55 = vadd.f32 %v693_v54, %v692_v50 }
 0x468   :  { %v710_v19 = vpack.c.bf16 %v2091_v55, %v2091_v55 }
 0x46a   :  { %744 = vmatmul.mubr.bf16.vlgmr.msra.gmra.mrb[16].mxu0 %v710_v19  ;;  %1463 = vmatmul.mubr.bf16.vlgmr.msra.gmra.mrb[16].mxu1 %v710_v19 }
 0x46b   :  { %839 = vmatpush1.bf16.msra.mxu0 %v1735_v1  ;;  %1467 = vmatpush3.bf16.msra.mxu1 %v1782_v10  ;;  %v952_v1 = vsel %vm951_vm6, 1, %v1697_v2 }
 0x46c   :  { %840 = vmatprep.subr.bf16.mxu0 %v1743_v4  ;;  %1468 = vmatprep.subr.bf16.mxu1 %v1698_v3  ;;  %v1278_v4 = vld [vmem:[%s2329_s0 + $0x30] sm:$0xff] }
 0x46d   :  { %870 = vmatprep.mubr.bf16.mxu0 %v1697_v2  ;;  %1482 = vmatprep.mubr.msk.bf16.mxu1 %vm1699_vm0, %v1698_v3 }
 0x46e   :  { %954 = vperm.xlu1 %1532, %v952_v1  }
 0x46f   :  { %841 = vmatpush1.bf16.msra.mxu0 %v1751_v5  ;;  %1469 = vmatpush3.bf16.msra.mxu1 %v1794_v12  ;;  %v707_v5 = vunpack.c.l.bf16 %v1278_v4 }
 0x470   :  { %842 = vmatprep.subr.bf16.mxu0 %v1758_v6  ;;  %1470 = vmatprep.subr.bf16.mxu1 %v1698_v3  ;;  %v708_v6 = vunpack.c.h.bf16 %v1278_v4 }
 0x473   :  { %843 = vmatpush1.bf16.msra.mxu0 %v1765_v7  ;;  %1471 = vmatpush3.bf16.msra.mxu1 %v1813_v15 }
 0x474   :  { %844 = vmatprep.subr.bf16.mxu0 %v1771_v8  ;;  %1472 = vmatprep.subr.bf16.mxu1 %v1698_v3 }
 0x477   :  { %845 = vmatpush1.bf16.msra.mxu0 %v1776_v9  ;;  %1473 = vmatpush3.bf16.msra.mxu1 %v1839_v20 }
 0x478   :  { %846 = vmatprep.subr.bf16.mxu0 %v1788_v11  ;;  %1474 = vmatprep.subr.bf16.mxu1 %v1698_v3 }
 0x47b   :  { %847 = vmatpush1.bf16.msra.mxu0 %v1801_v13  ;;  %1475 = vmatpush3.bf16.msra.mxu1 %v1858_v23 }
 0x47c   :  { %848 = vmatprep.subr.bf16.mxu0 %v1807_v14  ;;  %1476 = vmatprep.subr.bf16.mxu1 %v1698_v3 }
 0x47f   :  { %849 = vmatpush1.bf16.msra.mxu0 %v1825_v17  ;;  %1477 = vmatpush3.bf16.msra.mxu1 %v1872_v25 }
 0x480   :  { %850 = vmatprep.subr.bf16.mxu0 %v1832_v18  ;;  %1478 = vmatprep.subr.bf16.mxu1 %v1698_v3 }
 0x483   :  { %851 = vmatpush1.bf16.msra.mxu0 %v1846_v21  ;;  %1479 = vmatpush3.bf16.msra.mxu1 %v1881_v26 }
 0x484   :  { %852 = vmatprep.subr.bf16.mxu0 %v1852_v22  ;;  %1480 = vmatprep.subr.bf16.mxu1 %v1698_v3 }
 0x487   :  { %853 = vmatpush1.bf16.msra.mxu0 %v1865_v24  ;;  %1481 = vmatpush3.bf16.msra.mxu1 %v1891_v28 }
 0x488   :  { %965 = vmatprep.subr.bf16.mxu0 %v1730_v0  ;;  %1486 = vmatprep.subr.bf16.mxu1 %v1698_v3 }
 0x53d   :  { %v745_v52 = vpop.f32.mrb[16].mxu0  ;;  %v786_v56 = vpop.f32.mrb[16].mxu1 }
 0x53e   :  { %v792_v57 = vadd.f32 %v745_v52, %v707_v5  ;;  %v747_v58 = vpop.f32.mrb[17].mxu0  ;;  %v1464_v59 = vpop.f32.mrb[17].mxu1  ;;  %v812_v42 = vadd.f32 %v1936_v51, %v786_v56  ;;  %v2150_v52 = vld [vmem:[%s2331_s2] ss:$12 sps:$4 sm:$0xff]   ;;  %v2157_v56 = vld [vmem:[%s2331_s2 + $0x1c] ss:$12 sps:$4 sm:$0xff]  }
 0x53f   :  { %v749_v60 = vpop.f32.mrb[18].mxu0  ;;  %v789_v0 = vpop.f32.mrb[18].mxu1  ;;  %v793_v62 = vadd.f32 %v747_v58, %v708_v6 }
 0x540   :  { %v794_v61 = vpack.c.bf16 %v792_v57, %v792_v57  ;;  %v750_v63 = vpop.f32.mrb[19].mxu0  ;;  %v1465_v27 = vpop.f32.mrb[19].mxu1  ;;  %v2167_v57 = vld [vmem:[%s2331_s2 + $0x18] ss:$12 sps:$4 sm:$0xff]  }
 0x541   :  { %v795_v30 = vpack.c.bf16 %v793_v62, %v793_v62  ;;  %v836_v63 = vunpack.c.h.bf16 %v2138_v53 }
 0x542   :  { %v1280_v29 = vmul.bf16 3216621497, %v794_v61 }
 0x543   :  { %v1281_v31 = vmul.bf16 3216621497, %v795_v30 }
 0x544   :  { %1605 = vpow.bf16 %v1280_v29 }
 0x545   :  { %1607 = vpow.bf16 %v1281_v31 }
 0x54f   :  { %v1606_v33 = vpop.eup %1605 }
 0x550   :  { %v804_v34 = vadd.bf16 1065369472, %v1606_v33  ;;  %v1608_v35 = vpop.eup %1607 }
 0x551   :  { %v805_v36 = vadd.bf16 1065369472, %v1608_v35 }
 0x552   :  { %1609 = vrcp.bf16 %v804_v34 }
 0x553   :  { %1611 = vrcp.bf16 %v805_v36 }
 0x55d   :  { %v1610_v37 = vpop.eup %1609 }
 0x55e   :  { %v807_v39 = vmul.bf16 1065369472, %v1610_v37  ;;  %v1612_v47 = vpop.eup %1611 }
 0x55f   :  { %v809_v48 = vmul.bf16 1065369472, %v1612_v47  ;;  %v1654_v47 = vld [vmem:[%s2331_s2 + $0x30] ss:$12 sps:$4 sm:$0xff]  }
 0x560   :  { %v810_v41 = vunpack.c.l.bf16 %v807_v39 }
 0x561   :  { %v811_v49 = vunpack.c.l.bf16 %v809_v48  ;;  %v1655_v48 = vld [vmem:[%s2331_s2 + $0x38] ss:$12 sps:$4 sm:$0xff]  }
 0x562   :  { %v813_v43 = vmul.f32 %v812_v42, %v810_v41 }
 0x563   :  { %v818_v19 = vsub.f32 1.0, %v811_v49  ;;  %v820_v4 = vmul.f32 %v811_v49, %v2091_v55  ;;  %v1656_v49 = vld [vmem:[%s2331_s2 + $0x4c] ss:$12 sps:$4 sm:$0xff]  }
 0x564   :  { %v814_v46 = vadd.f32 %v813_v43, %v709_v40 }
 0x566   :  { %v815_v44 = vpack.c.bf16 %v814_v46, %v814_v46  ;;  %v1652_v46 = vld [vmem:[%s2331_s2 + $0x8] ss:$12 sps:$4 sm:$0xff]  }
 0x568   :  { %1613 = vtanh.bf16 %v815_v44  ;;  %v1653_v44 = vld [vmem:[%s2331_s2 + $0x20] ss:$12 sps:$4 sm:$0xff]  }
 0x573   :  { %v1614_v50 = vpop.eup %1613 }
 0x574   :  { %v817_v54 = vunpack.c.l.bf16 %v1614_v50  ;;  %v1657_v50 = vld [vmem:[%s2331_s2 + $0x48] ss:$12 sps:$4 sm:$0xff]  }
 0x576   :  { %v819_v1 = vmul.f32 %v818_v19, %v817_v54  ;;  %v1658_v54 = vld [vmem:[%s2331_s2 + $0x50] ss:$12 sps:$4 sm:$0xff]  }
 0x577   :  { %v1659_v19 = vld [vmem:[%s2331_s2 + $0x64] ss:$12 sps:$4 sm:$0xff]  }
 0x578   :  { %v2143_v5 = vadd.f32 %v820_v4, %v819_v1  ;;  %v1660_v1 = vld [vmem:[%s2331_s2 + $0x60] ss:$12 sps:$4 sm:$0xff]   ;;  %v1661_v4 = vld [vmem:[%s2331_s2 + $0x68] ss:$12 sps:$4 sm:$0xff]  }
 0x57a   :  { %v837_v6 = vpack.c.bf16 %v2143_v5, %v2143_v5 }
 0x57c   :  { %871 = vmatmul.mubr.bf16.vlgmr.msra.gmra.mrb[20].mxu0 %v837_v6  ;;  %1483 = vmatmul.mubr.bf16.vlgmr.msra.gmra.mrb[20].mxu1 %v837_v6  ;;  %v1662_v6 = vld [vmem:[%s2331_s2 + $0x7c] ss:$12 sps:$4 sm:$0xff]  }
 0x57d   :  { %966 = vmatpush1.bf16.msra.mxu0 %v2150_v52  ;;  %1487 = vmatpush3.bf16.msra.mxu1 %v1782_v10  ;;  %v2174_v10 = vld [vmem:[%s2331_s2 + $0x34] ss:$12 sps:$4 sm:$0xff]  }
 0x57e   :  { %967 = vmatprep.subr.bf16.mxu0 %v2157_v56  ;;  %1488 = vmatprep.subr.bf16.mxu1 %v1698_v3 }
 0x57f   :  { %997 = vmatprep.mubr.bf16.mxu0 %v1697_v2  ;;  %1502 = vmatprep.mubr.msk.bf16.mxu1 %vm1699_vm0, %v1698_v3 }
 0x581   :  { %968 = vmatpush1.bf16.msra.mxu0 %v2167_v57  ;;  %1489 = vmatpush3.bf16.msra.mxu1 %v1794_v12 }
 0x582   :  { %969 = vmatprep.subr.bf16.mxu0 %v2174_v10  ;;  %1490 = vmatprep.subr.bf16.mxu1 %v1698_v3 }
 0x585   :  { %970 = vmatpush1.bf16.msra.mxu0 %v1765_v7  ;;  %1491 = vmatpush3.bf16.msra.mxu1 %v1813_v15  ;;  %v1651_v7 = vld [vmem:[%s2331_s2 + $0x4] ss:$12 sps:$4 sm:$0xff]  }
 0x586   :  { %971 = vmatprep.subr.bf16.mxu0 %v1771_v8  ;;  %1492 = vmatprep.subr.bf16.mxu1 %v1698_v3  ;;  %v1079_v8 = vsel %vm1078_vm7, 1, %v1697_v2 }
 0x587   :  { %1081 = vperm.xlu0 %1531, %v1079_v8   ;;  %v1668_v8 = vld [vmem:[%s2331_s2 + $0xac] ss:$12 sps:$4 sm:$0xff]  }
 0x589   :  { %972 = vmatpush1.bf16.msra.mxu0 %v1776_v9  ;;  %1493 = vmatpush3.bf16.msra.mxu1 %v1839_v20  ;;  %v1282_v9 = vld [vmem:[%s2329_s0 + $0x3c] sm:$0xff] }
 0x58a   :  { %973 = vmatprep.subr.bf16.mxu0 %v1788_v11  ;;  %1494 = vmatprep.subr.bf16.mxu1 %v1698_v3  ;;  %v834_v11 = vunpack.c.l.bf16 %v1282_v9  ;;  %v835_v12 = vunpack.c.h.bf16 %v1282_v9  ;;  %v1669_v9 = vld [vmem:[%s2331_s2 + $0xa8] ss:$12 sps:$4 sm:$0xff]  }
 0x58d   :  { %974 = vmatpush1.bf16.msra.mxu0 %v1801_v13  ;;  %1495 = vmatpush3.bf16.msra.mxu1 %v1858_v23 }
 0x58e   :  { %975 = vmatprep.subr.bf16.mxu0 %v1807_v14  ;;  %1496 = vmatprep.subr.bf16.mxu1 %v1698_v3 }
 0x591   :  { %976 = vmatpush1.bf16.msra.mxu0 %v1825_v17  ;;  %1497 = vmatpush3.bf16.msra.mxu1 %v1872_v25 }
 0x592   :  { %977 = vmatprep.subr.bf16.mxu0 %v1832_v18  ;;  %1498 = vmatprep.subr.bf16.mxu1 %v1698_v3 }
 0x595   :  { %978 = vmatpush1.bf16.msra.mxu0 %v1846_v21  ;;  %1499 = vmatpush3.bf16.msra.mxu1 %v1881_v26 }
 0x596   :  { %979 = vmatprep.subr.bf16.mxu0 %v1852_v22  ;;  %1500 = vmatprep.subr.bf16.mxu1 %v1698_v3 }
 0x599   :  { %980 = vmatpush1.bf16.msra.mxu0 %v1865_v24  ;;  %1501 = vmatpush3.bf16.msra.mxu1 %v1891_v28 }
 0x59a   :  { %1092 = vmatprep.subr.bf16.mxu0 %v1651_v7  ;;  %1506 = vmatprep.subr.bf16.mxu1 %v1698_v3  ;;  %v1667_v7 = vld [vmem:[%s2331_s2 + $0x98] ss:$12 sps:$4 sm:$0xff]  }
 0x64f   :  { %v872_v13 = vpop.f32.mrb[20].mxu0  ;;  %v913_v14 = vpop.f32.mrb[20].mxu1 }
 0x650   :  { %v919_v15 = vadd.f32 %v872_v13, %v834_v11  ;;  %v874_v17 = vpop.f32.mrb[21].mxu0  ;;  %v1484_v18 = vpop.f32.mrb[21].mxu1  ;;  %v939_v29 = vadd.f32 %v1936_v51, %v913_v14  ;;  %v1670_v11 = vld [vmem:[%s2331_s2 + $0xb0] ss:$12 sps:$4 sm:$0xff]  }
 0x651   :  { %v876_v20 = vpop.f32.mrb[22].mxu0  ;;  %v916_v21 = vpop.f32.mrb[22].mxu1  ;;  %v920_v23 = vadd.f32 %v874_v17, %v835_v12  ;;  %v1671_v12 = vld [vmem:[%s2330_s1] sm:$0xff] }
 0x652   :  { %v921_v22 = vpack.c.bf16 %v919_v15, %v919_v15  ;;  %v877_v24 = vpop.f32.mrb[23].mxu0  ;;  %v1485_v16 = vpop.f32.mrb[23].mxu1  ;;  %vm1205_vm8 = vcmp.eq.s32.totalorder %v1671_v12, 8 }
 0x653   :  { %v922_v26 = vpack.c.bf16 %v920_v23, %v920_v23  ;;  %v1206_v13 = vsel %vm1205_vm8, 1, %v1697_v2 }
 0x654   :  { %v1284_v25 = vmul.bf16 3216621497, %v921_v22  ;;  %1208 = vperm.xlu1 %1532, %v1206_v13  }
 0x655   :  { %v1285_v28 = vmul.bf16 3216621497, %v922_v26 }
 0x656   :  { %1615 = vpow.bf16 %v1284_v25 }
 0x657   :  { %1617 = vpow.bf16 %v1285_v28 }
 0x661   :  { %v1616_v58 = vpop.eup %1615 }
 0x662   :  { %v931_v59 = vadd.bf16 1065369472, %v1616_v58  ;;  %v1618_v60 = vpop.eup %1617 }
 0x663   :  { %v932_v0 = vadd.bf16 1065369472, %v1618_v60 }
 0x664   :  { %1619 = vrcp.bf16 %v931_v59 }
 0x665   :  { %1621 = vrcp.bf16 %v932_v0 }
 0x66f   :  { %v1620_v61 = vpop.eup %1619 }
 0x670   :  { %v934_v62 = vmul.bf16 1065369472, %v1620_v61  ;;  %v1622_v34 = vpop.eup %1621 }
 0x671   :  { %v936_v35 = vmul.bf16 1065369472, %v1622_v34 }
 0x672   :  { %v937_v27 = vunpack.c.l.bf16 %v934_v62 }
 0x673   :  { %v938_v36 = vunpack.c.l.bf16 %v936_v35 }
 0x674   :  { %v940_v30 = vmul.f32 %v939_v29, %v937_v27  ;;  %v1287_v27 = vld [vmem:[%s2329_s0 + $0x50] ss:$12 sps:$4 sm:$0xff]  }
 0x675   :  { %v945_v40 = vsub.f32 1.0, %v938_v36  ;;  %v947_v42 = vmul.f32 %v938_v36, %v2143_v5 }
 0x676   :  { %v941_v31 = vadd.f32 %v940_v30, %v836_v63  ;;  %v963_v30 = vunpack.c.l.bf16 %v1287_v27 }
 0x678   :  { %v942_v33 = vpack.c.bf16 %v941_v31, %v941_v31 }
 0x67a   :  { %1623 = vtanh.bf16 %v942_v33 }
 0x685   :  { %v1624_v37 = vpop.eup %1623 }
 0x686   :  { %v944_v39 = vunpack.c.l.bf16 %v1624_v37 }
 0x688   :  { %v946_v41 = vmul.f32 %v945_v40, %v944_v39 }
 0x68a   :  { %v2212_v43 = vadd.f32 %v947_v42, %v946_v41 }
 0x68c   :  { %v964_v53 = vpack.c.bf16 %v2212_v43, %v2212_v43 }
 0x68e   :  { %998 = vmatmul.mubr.bf16.vlgmr.msra.gmra.mrb[24].mxu0 %v964_v53  ;;  %1503 = vmatmul.mubr.bf16.vlgmr.msra.gmra.mrb[24].mxu1 %v964_v53 }
 0x68f   :  { %1093 = vmatpush1.bf16.msra.mxu0 %v2150_v52  ;;  %1507 = vmatpush3.bf16.msra.mxu1 %v1652_v46  ;;  %v1663_v52 = vld [vmem:[%s2331_s2 + $0x78] ss:$12 sps:$4 sm:$0xff]  }
 0x690   :  { %1094 = vmatprep.subr.bf16.mxu0 %v2157_v56  ;;  %1508 = vmatprep.subr.bf16.mxu1 %v1698_v3  ;;  %v1664_v56 = vld [vmem:[%s2331_s2 + $0x80] ss:$12 sps:$4 sm:$0xff]  }
 0x691   :  { %1124 = vmatprep.mubr.bf16.mxu0 %v1697_v2  ;;  %1522 = vmatprep.mubr.msk.bf16.mxu1 %vm1699_vm0, %v1698_v3 }
 0x693   :  { %1095 = vmatpush1.bf16.msra.mxu0 %v2167_v57  ;;  %1509 = vmatpush3.bf16.msra.mxu1 %v1653_v44  ;;  %v1665_v57 = vld [vmem:[%s2331_s2 + $0x94] ss:$12 sps:$4 sm:$0xff]  }
 0x694   :  { %1096 = vmatprep.subr.bf16.mxu0 %v2174_v10  ;;  %1510 = vmatprep.subr.bf16.mxu1 %v1698_v3  ;;  %v1666_v10 = vld [vmem:[%s2331_s2 + $0x90] ss:$12 sps:$4 sm:$0xff]  }
 0x697   :  { %1097 = vmatpush1.bf16.msra.mxu0 %v1654_v47  ;;  %1511 = vmatpush3.bf16.msra.mxu1 %v1655_v48 }
 0x698   :  { %1098 = vmatprep.subr.bf16.mxu0 %v1656_v49  ;;  %1512 = vmatprep.subr.bf16.mxu1 %v1698_v3 }
 0x69b   :  { %1099 = vmatpush1.bf16.msra.mxu0 %v1657_v50  ;;  %1513 = vmatpush3.bf16.msra.mxu1 %v1658_v54 }
 0x69c   :  { %1100 = vmatprep.subr.bf16.mxu0 %v1659_v19  ;;  %1514 = vmatprep.subr.bf16.mxu1 %v1698_v3 }
 0x69f   :  { %1101 = vmatpush1.bf16.msra.mxu0 %v1660_v1  ;;  %1515 = vmatpush3.bf16.msra.mxu1 %v1661_v4 }
 0x6a0   :  { %1102 = vmatprep.subr.bf16.mxu0 %v1662_v6  ;;  %1516 = vmatprep.subr.bf16.mxu1 %v1698_v3 }
 0x6a3   :  { %1103 = vmatpush1.bf16.msra.mxu0 %v1663_v52  ;;  %1517 = vmatpush3.bf16.msra.mxu1 %v1664_v56 }
 0x6a4   :  { %1104 = vmatprep.subr.bf16.mxu0 %v1665_v57  ;;  %1518 = vmatprep.subr.bf16.mxu1 %v1698_v3 }
 0x6a7   :  { %1105 = vmatpush1.bf16.msra.mxu0 %v1666_v10  ;;  %1519 = vmatpush3.bf16.msra.mxu1 %v1667_v7 }
 0x6a8   :  { %1106 = vmatprep.subr.bf16.mxu0 %v1668_v8  ;;  %1520 = vmatprep.subr.bf16.mxu1 %v1698_v3  ;;  %v1286_v3 = vld [vmem:[%s2329_s0 + $0x48] sm:$0xff] }
 0x6a9   :  { %v961_v14 = vunpack.c.l.bf16 %v1286_v3  ;;  %v962_v15 = vunpack.c.h.bf16 %v1286_v3 }
 0x6ab   :  { %1107 = vmatpush1.bf16.msra.mxu0 %v1669_v9  ;;  %1521 = vmatpush3.bf16.msra.mxu1 %v1670_v11 }
 0x761   :  { %v999_v17 = vpop.f32.mrb[24].mxu0  ;;  %v1040_v18 = vpop.f32.mrb[24].mxu1 }
 0x762   :  { %v1046_v20 = vadd.f32 %v999_v17, %v961_v14  ;;  %v1001_v21 = vpop.f32.mrb[25].mxu0  ;;  %v1504_v22 = vpop.f32.mrb[25].mxu1  ;;  %v1066_v33 = vadd.f32 %v1936_v51, %v1040_v18  ;;  %v1290_v51 = vld [vmem:[%s2329_s0 + $0x54] sm:$0xff] }
 0x763   :  { %v1003_v23 = vpop.f32.mrb[26].mxu0  ;;  %v1043_v24 = vpop.f32.mrb[26].mxu1  ;;  %v1047_v25 = vadd.f32 %v1001_v21, %v962_v15  ;;  %v1088_v49 = vunpack.c.l.bf16 %v1290_v51  ;;  %v1089_v50 = vunpack.c.h.bf16 %v1290_v51  ;;  %v1672_v22 = vld [vmem:[%s2332_s3] ss:$0 sm:$0xff]  ;;  %s1701_s3 = smov [#allocation4]  }
 0x764   :  { %v1048_v16 = vpack.c.bf16 %v1046_v20, %v1046_v20  ;;  %v1004_v26 = vpop.f32.mrb[27].mxu0  ;;  %v1505_v28 = vpop.f32.mrb[27].mxu1  ;;  %v1090_v20 = vunpack.c.h.bf16 %v1287_v27  ;;  %s1231_s10 = sshll.u32 %s1701_s3, 4  ;;  %s1232_s10 = int_to_ptr.vmem [resolvable:$true] %s1231_s10 }
 0x765   :  { %v1049_v2 = vpack.c.bf16 %v1047_v25, %v1047_v25  ;;  %v320_v26 = vpop.permute.xlu0 %319  ;;  %s1673_s11 = scalar_lea.vmem %s1232_s10, 128  ;;  %p1678_p1 = scmp.lt.s32.totalorder %s1232_s10, %s1232_s10 }
 0x766   :  { %v1288_v58 = vmul.bf16 3216621497, %v1048_v16  ;;  %vm321_vm9 = vcmp.eq.s32.totalorder %v320_v26, 1  ;;  %p1674_p0 = scmp.ne.s32.totalorder %s1232_s10, %s1673_s11  ;;  %p1679_p2 = scmp.lt.s32.totalorder %s1673_s11, %s1673_s11 }
 0x767   :  { %v1289_v59 = vmul.bf16 3216621497, %v1049_v2  ;;  %v322_v27 = vsel %vm321_vm9, %v1945_v32, 0.0 }
 0x768   :  { %1625 = vpow.bf16 %v1288_v58  ;;  %v574_v58 = vpop.permute.xlu1 %573  ;;  %p1680_p3 = por %p1679_p2, %p1678_p1 }
 0x769   :  { %1627 = vpow.bf16 %v1289_v59  ;;  %v447_v2 = vpop.permute.xlu0 %446  ;;  %vm575_vm11 = vcmp.eq.s32.totalorder %v574_v58, 1 }
 0x76a   :  { %vm448_vm10 = vcmp.eq.s32.totalorder %v447_v2, 1  ;;  %p1681_p4 = pnand %p1680_p3, %p1674_p0 }
 0x773   :  { %v1626_v60 = vpop.eup %1625 }
 0x774   :  { %v1058_v0 = vadd.bf16 1065369472, %v1626_v60  ;;  %v1628_v61 = vpop.eup %1627  ;;  %v701_v60 = vpop.permute.xlu1 %700 }
 0x775   :  { %v1059_v62 = vadd.bf16 1065369472, %v1628_v61  ;;  %vm702_vm12 = vcmp.eq.s32.totalorder %v701_v60, 1 }
 0x776   :  { %1629 = vrcp.bf16 %v1058_v0  ;;  %v828_v0 = vpop.permute.xlu0 %827 }
 0x777   :  { %1631 = vrcp.bf16 %v1059_v62  ;;  %vm829_vm13 = vcmp.eq.s32.totalorder %v828_v0, 1 }
 0x778   :  { %v955_v62 = vpop.permute.xlu1 %954 }
 0x779   :  { %vm956_vm14 = vcmp.eq.s32.totalorder %v955_v62, 1 }
 0x781   :  { %v1630_v63 = vpop.eup %1629 }
 0x782   :  { %v1061_v29 = vmul.bf16 1065369472, %v1630_v63  ;;  %v1632_v37 = vpop.eup %1631 }
 0x783   :  { %v1063_v39 = vmul.bf16 1065369472, %v1632_v37 }
 0x784   :  { %v1064_v31 = vunpack.c.l.bf16 %v1061_v29  ;;  %v1082_v29 = vpop.permute.xlu0 %1081 }
 0x785   :  { %v1065_v40 = vunpack.c.l.bf16 %v1063_v39  ;;  %vm1083_vm15 = vcmp.eq.s32.totalorder %v1082_v29, 1 }
 0x786   :  { %v1067_v34 = vmul.f32 %v1066_v33, %v1064_v31 }
 0x787   :  { %v1072_v53 = vsub.f32 1.0, %v1065_v40  ;;  %v1074_v44 = vmul.f32 %v1065_v40, %v2212_v43 }
 0x788   :  { %v1068_v35 = vadd.f32 %v1067_v34, %v963_v30  ;;  %v449_v30 = vsel %vm448_vm10, %v1992_v38, %v322_v27 }
 0x789   :  { %v576_v34 = vsel %vm575_vm11, %v2044_v45, %v449_v30 }
 0x78a   :  { %v1069_v36 = vpack.c.bf16 %v1068_v35, %v1068_v35  ;;  %v703_v35 = vsel %vm702_vm12, %v2091_v55, %v576_v34 }
 0x78b   :  { %v830_v40 = vsel %vm829_vm13, %v2143_v5, %v703_v35 }
 0x78c   :  { %1633 = vtanh.bf16 %v1069_v36  ;;  %v1209_v36 = vpop.permute.xlu1 %1208  ;;  %v957_v32 = vsel %vm956_vm14, %v2212_v43, %v830_v40 }
 0x78d   :  { %vm1210_vm0 = vcmp.eq.s32.totalorder %v1209_v36, 1 }
 0x797   :  { %v1634_v41 = vpop.eup %1633 }
 0x798   :  { %v1071_v42 = vunpack.c.l.bf16 %v1634_v41 }
 0x79a   :  { %v1073_v46 = vmul.f32 %v1072_v53, %v1071_v42 }
 0x79c   :  { %v2299_v47 = vadd.f32 %v1074_v44, %v1073_v46 }
 0x79e   :  { %v1091_v48 = vpack.c.bf16 %v2299_v47, %v2299_v47  ;;  %v1084_v38 = vsel %vm1083_vm15, %v2299_v47, %v957_v32 }
 0x7a0   :  { %1125 = vmatmul.mubr.bf16.vlgmr.msra.gmra.mrb[28].mxu0 %v1091_v48  ;;  %1523 = vmatmul.mubr.bf16.vlgmr.msra.gmra.mrb[28].mxu1 %v1091_v48 }
 0x873   :  { %v1126_v54 = vpop.f32.mrb[28].mxu0  ;;  %v1167_v19 = vpop.f32.mrb[28].mxu1 }
 0x874   :  { %v1173_v1 = vadd.f32 %v1126_v54, %v1088_v49  ;;  %v1128_v4 = vpop.f32.mrb[29].mxu0  ;;  %v1524_v6 = vpop.f32.mrb[29].mxu1  ;;  %v1193_v23 = vadd.f32 %v1672_v22, %v1167_v19 }
 0x875   :  { %v1130_v52 = vpop.f32.mrb[30].mxu0  ;;  %v1170_v56 = vpop.f32.mrb[30].mxu1  ;;  %v1174_v10 = vadd.f32 %v1128_v4, %v1089_v50 }
 0x876   :  { %v1175_v57 = vpack.c.bf16 %v1173_v1, %v1173_v1  ;;  %v1131_v7 = vpop.f32.mrb[31].mxu0  ;;  %v1525_v8 = vpop.f32.mrb[31].mxu1 }
 0x877   :  { %v1176_v11 = vpack.c.bf16 %v1174_v10, %v1174_v10 }
 0x878   :  { %v1292_v9 = vmul.bf16 3216621497, %v1175_v57 }
 0x879   :  { %v1293_v12 = vmul.bf16 3216621497, %v1176_v11 }
 0x87a   :  { %1635 = vpow.bf16 %v1292_v9 }
 0x87b   :  { %1637 = vpow.bf16 %v1293_v12 }
 0x885   :  { %v1636_v13 = vpop.eup %1635 }
 0x886   :  { %v1185_v3 = vadd.bf16 1065369472, %v1636_v13  ;;  %v1638_v14 = vpop.eup %1637 }
 0x887   :  { %v1186_v15 = vadd.bf16 1065369472, %v1638_v14 }
 0x888   :  { %1639 = vrcp.bf16 %v1185_v3 }
 0x889   :  { %1641 = vrcp.bf16 %v1186_v15 }
 0x893   :  { %v1640_v17 = vpop.eup %1639 }
 0x894   :  { %v1188_v18 = vmul.bf16 1065369472, %v1640_v17  ;;  %v1642_v28 = vpop.eup %1641 }
 0x895   :  { %v1190_v59 = vmul.bf16 1065369472, %v1642_v28 }
 0x896   :  { %v1191_v21 = vunpack.c.l.bf16 %v1188_v18 }
 0x897   :  { %v1192_v61 = vunpack.c.l.bf16 %v1190_v59 }
 0x898   :  { %v1194_v24 = vmul.f32 %v1193_v23, %v1191_v21 }
 0x899   :  { %v1199_v33 = vsub.f32 1.0, %v1192_v61  ;;  %v1201_v39 = vmul.f32 %v1192_v61, %v2299_v47 }
 0x89a   :  { %v1195_v16 = vadd.f32 %v1194_v24, %v1090_v20 }
 0x89c   :  { %v1196_v25 = vpack.c.bf16 %v1195_v16, %v1195_v16 }
 0x89e   :  { %1643 = vtanh.bf16 %v1196_v25 }
 0x8a9   :  { %v1644_v63 = vpop.eup %1643 }
 0x8aa   :  { %v1198_v31 = vunpack.c.l.bf16 %v1644_v63 }
 0x8ac   :  { %v1200_v37 = vmul.f32 %v1199_v33, %v1198_v31 }
 0x8ae   :  { %v1202_v41 = vadd.f32 %v1201_v39, %v1200_v37 }
 0x8b0   :  { %v1211_v42 = vsel %vm1210_vm0, %v1202_v41, %v1084_v38 }
 0x8b1   :  { %v1218_v53 = vmul.f32 %v1211_v42, %v1211_v42 }
 0x8b3   :  { %1219 = vadd.xlane.f32.xlu0 %v1218_v53 }
 0x940   :  { %v1220_v45 = vpop.xlane.xlu0 %1219 }
 0x941   :  { %v1221_v46 = vadd.f32 1e-12, %v1220_v45 }
 0x943   :  { %1645 = vrsqrt.f32 %v1221_v46 }
 0x94d   :  { %v1646_v55 = vpop.eup %1645 }
 0x94e   :  { %v1223_v44 = vmul.f32 %v1646_v55, %v1211_v42 }
 0x950   :  { %1224 = vst [vmem:[#allocation4] sm:$0xff] %v1223_v44 }
 0x951   :  { %1684 = shalt.err (!%p1681_p4)
}
 0x952   :  { %s1685_s14 = scalar_lea.hbm %s2333_s4, 128 }
 0x953   :  { %p1686_p5 = scmp.ne.s32.totalorder %s2333_s4, %s1685_s14  ;;  %p1689_p6 = scmp.lt.u32.totalorder %s1685_s14, %s2333_s4 }
 0x955   :  { %p1691_p7 = pnand %p1689_p6, %p1686_p5 }
 0x957   :  { %1694 = shalt.err (!%p1691_p7)
}
 0x958   :  { %1234 = dma.vmem_to_hbm [thread:$0]  %s1232_s10, 128, %s2333_s4, [#allocation5]  }
 0x959   :  { %1695 = dma.done.wait [#allocation5], 128  }
 0x95a   :  { %1696 = vsyncadd [#allocation5], 4294967168 }
 0x95b   :  { %1238 = vsyncpa [#allocation5], 1 }

</bundles_post_ra>
